<compile_context>
chip_gen: v6e
topology: v6e:2x2x1
jax: 0.10.0
libtpu: 0.0.40
codegen_flags: <defaults>
</compile_context>

<pallas_src>
import math
from functools import partial

import jax
import jax.numpy as jnp
from jax import lax
from jax.experimental import pallas as pl
from jax.experimental.pallas import tpu as pltpu


def _gelu_erf(x):
    # Matches the reference: x * 0.5 * (1 + erf(x / sqrt(2)))
    return x * 0.5 * (1.0 + lax.erf(x / math.sqrt(2.0)))


def _layer_norm(x, gamma, beta, eps):
    mean = jnp.mean(x, axis=-1, keepdims=True)
    var = jnp.mean(jnp.square(x - mean), axis=-1, keepdims=True)
    return (x - mean) * lax.rsqrt(var + eps) * gamma + beta


def block_kernel(x_ref,
                 ln1_g_ref, ln1_b_ref,
                 w_qkv_ref,                  # (C, 3C) bf16, qk scale folded into Q cols
                 w_proj_ref, b_proj_ref,     # (C, C) bf16 / (1, C) f32
                 ln2_g_ref, ln2_b_ref,
                 w_fc1_ref, b_fc1_ref,
                 w_fc2_ref, b_fc2_ref,
                 o_ref,
                 qkv_scr,                    # VMEM (M, 3C) bf16 scratch
                 ctx_scr,                    # VMEM (M, C)  bf16 scratch
                 *, batch_tile, seq_len, num_heads, eps):
    Bt, N, H = batch_tile, seq_len, num_heads
    C = x_ref.shape[-1]
    hd = C // H
    M = Bt * N
    mm_dtype = w_qkv_ref.dtype

    # Load the (Bt, N, C) block, flatten batch*seq -> tall M for dense matmuls.
    x = x_ref[...].astype(jnp.float32).reshape(M, C)

    # ---------------- LayerNorm 1 (f32 stats) ----------------
    xn_mm = _layer_norm(x, ln1_g_ref[...], ln1_b_ref[...], eps).astype(mm_dtype)

    # ---------------- Attention ----------------
    # One fused, full-width QKV projection; stage the bf16 result once in VMEM so the
    # per-(head, batch) score matmuls read lane-dense sub-tiles from a ref.
    qkv_scr[...] = jnp.dot(xn_mm, w_qkv_ref[...],
                           preferred_element_type=jnp.float32).astype(mm_dtype)

    # Attention mixes only within one batch element.  Each head's context is written
    # once into its lane slot of ctx_scr; the output projection is a single
    # (M, C) x (C, C) matmul afterwards (no per-head f32 RMW accumulator, no zeroing).
    for h in range(H):
        c0 = h * hd
        for b in range(Bt):
            r0 = b * N
            qhb = qkv_scr[r0:r0 + N, c0:c0 + hd]                       # (N, hd) bf16
            khb = qkv_scr[r0:r0 + N, C + c0:C + c0 + hd]
            vhb = qkv_scr[r0:r0 + N, 2 * C + c0:2 * C + c0 + hd]
            # scores: contract head_dim of q against head_dim of k (no materialized k.T)
            s = lax.dot_general(qhb, khb,
                                dimension_numbers=(((1,), (1,)), ((), ())),
                                preferred_element_type=jnp.float32)    # (N, N) f32
            s = s - jnp.max(s, axis=-1, keepdims=True)
            p = jnp.exp(s)
            p = p * pl.reciprocal(jnp.sum(p, axis=-1, keepdims=True), approx=True)
            ctx = jnp.dot(p.astype(mm_dtype), vhb,
                          preferred_element_type=jnp.float32)          # (N, hd) f32
            ctx_scr[r0:r0 + N, c0:c0 + hd] = ctx.astype(mm_dtype)

    attn_out = jnp.dot(ctx_scr[...], w_proj_ref[...],
                       preferred_element_type=jnp.float32) + b_proj_ref[...]
    x1 = x + attn_out                                                  # residual 1 (f32)

    # ---------------- LayerNorm 2 + MLP ----------------
    x2n = _layer_norm(x1, ln2_g_ref[...], ln2_b_ref[...], eps).astype(mm_dtype)
    h1 = jnp.dot(x2n, w_fc1_ref[...],
                 preferred_element_type=jnp.float32) + b_fc1_ref[...]
    h1 = _gelu_erf(h1)                                                 # f32 GELU
    h2 = jnp.dot(h1.astype(mm_dtype), w_fc2_ref[...],
                 preferred_element_type=jnp.float32) + b_fc2_ref[...]

    o_ref[...] = (x1 + h2).reshape(Bt, N, C).astype(o_ref.dtype)       # residual 2


def _vmem_capacity_bytes(default=128 * 1024 * 1024):
    try:
        return int(getattr(pltpu.get_tpu_info(), "vmem_capacity_bytes", default))
    except Exception:
        return default


def _choose_batch_tile(B, N, target_rows, min_grid_steps=2):
    """Largest Bt dividing B with Bt*N <= target_rows, preferring >= min_grid_steps
    grid steps (keeps both v7x TensorCores busy).  Bt>1 only when N % 8 == 0 so
    per-batch sublane slices stay (8,128)-tile aligned."""
    if N % 8 != 0:
        return 1
    for need in (min_grid_steps, 1):
        cands = [bt for bt in range(1, B + 1)
                 if B % bt == 0 and bt * N <= max(target_rows, N) and B // bt >= need]
        if cands:
            return max(cands)
    return 1


def prepare_block_params(params, *, num_heads, mm_dtype=jnp.bfloat16):
    """One-time weight repack.  Call ONCE outside the per-step path (not per forward):
    folds the qk scale into the Q columns of the fused QKV weight and casts matmul
    weights to mm_dtype; LN params and biases stay f32."""
    C = params["w_qkv"].shape[0]
    hd = C // num_heads
    scale = hd ** (-0.5)                       # qk_scale=None -> head_dim ** -0.5
    w_qkv = params["w_qkv"].astype(jnp.float32)
    w_qkv = w_qkv.at[:, :C].multiply(scale)    # fold scale: zero kernel cost
    f32 = jnp.float32
    return {
        "ln1_g": params["ln1_g"].astype(f32), "ln1_b": params["ln1_b"].astype(f32),
        "w_qkv": w_qkv.astype(mm_dtype),
        "w_proj": params["w_proj"].astype(mm_dtype),
        "b_proj": params["b_proj"].astype(f32),
        "ln2_g": params["ln2_g"].astype(f32), "ln2_b": params["ln2_b"].astype(f32),
        "w_fc1": params["w_fc1"].astype(mm_dtype), "b_fc1": params["b_fc1"].astype(f32),
        "w_fc2": params["w_fc2"].astype(mm_dtype), "b_fc2": params["b_fc2"].astype(f32),
    }


def block_forward(x, prep, *, num_heads, eps=1e-5, target_rows=None,
                  single_buffer_weights=True):
    B, N, C = x.shape
    assert C % num_heads == 0
    Hhid = prep["w_fc1"].shape[1]
    mm_dtype = prep["w_qkv"].dtype

    # Generation-aware sizing: v5e/v6e (128 MiB VMEM) -> bigger row tile, ~96 MiB limit;
    # v7x (64 MiB/TC) -> ~48 MiB limit, leaving headroom for compiler-internal scratch.
    vmem_cap = _vmem_capacity_bytes()
    if target_rows is None:
        target_rows = 512 if vmem_cap >= 100 * 1024 * 1024 else 256
    vmem_limit = int(vmem_cap * 3 // 4)

    Bt = _choose_batch_tile(B, N, target_rows)
    grid = (B // Bt,)                          # "parallel" axis (megacore / 2-TC sharding)

    kernel = partial(block_kernel, batch_tile=Bt, seq_len=N,
                     num_heads=num_heads, eps=eps)

    def build(single_buf):
        wkw = {"pipeline_mode": pl.Buffered(1)} if single_buf else {}

        def wspec(shape):      # large step-invariant weight block (single-buffer if possible)
            return pl.BlockSpec(shape, lambda b: (0, 0), **wkw)

        def cspec(shape):      # small step-invariant params (LN, biases)
            return pl.BlockSpec(shape, lambda b: (0, 0))

        in_specs = [
            pl.BlockSpec((Bt, N, C), lambda b: (b, 0, 0)),   # x, Bt batch elements/step
            cspec((1, C)), cspec((1, C)),                    # ln1 gamma/beta (f32)
            wspec((C, 3 * C)),                               # fused QKV weight (bf16)
            wspec((C, C)), cspec((1, C)),                    # proj weight / bias
            cspec((1, C)), cspec((1, C)),                    # ln2 gamma/beta (f32)
            wspec((C, Hhid)), cspec((1, Hhid)),              # fc1 weight / bias
            wspec((Hhid, C)), cspec((1, C)),                 # fc2 weight / bias
        ]
        return pl.pallas_call(
            kernel,
            out_shape=jax.ShapeDtypeStruct((B, N, C), x.dtype),
            grid=grid,
            in_specs=in_specs,
            out_specs=pl.BlockSpec((Bt, N, C), lambda b: (b, 0, 0)),
            scratch_shapes=[pltpu.VMEM((Bt * N, 3 * C), mm_dtype),   # staged QKV
                            pltpu.VMEM((Bt * N, C), mm_dtype)],      # head contexts
            compiler_params=pltpu.CompilerParams(
                dimension_semantics=("parallel",),
                vmem_limit_bytes=vmem_limit,
            ),
        )

    args = (x,
            prep["ln1_g"], prep["ln1_b"],
            prep["w_qkv"],
            prep["w_proj"], prep["b_proj"],
            prep["ln2_g"], prep["ln2_b"],
            prep["w_fc1"], prep["b_fc1"],
            prep["w_fc2"], prep["b_fc2"])

    if single_buffer_weights:
        try:
            return build(True)(*args)
        except Exception:
            # pl.Buffered(1) (single-buffered step-invariant weights) not supported by
            # this jax/Mosaic build; fall back to default double-buffering.
            pass
    return build(False)(*args)


def init_params(key, dim, mlp_ratio=4.0):
    H = int(dim * mlp_ratio)
    ks = jax.random.split(key, 4)
    std = 0.02
    return {
        "ln1_g": jnp.ones((1, dim), jnp.float32),
        "ln1_b": jnp.zeros((1, dim), jnp.float32),
        "w_qkv": std * jax.random.normal(ks[0], (dim, 3 * dim), jnp.float32),
        "w_proj": std * jax.random.normal(ks[1], (dim, dim), jnp.float32),
        "b_proj": jnp.zeros((1, dim), jnp.float32),
        "ln2_g": jnp.ones((1, dim), jnp.float32),
        "ln2_b": jnp.zeros((1, dim), jnp.float32),
        "w_fc1": std * jax.random.normal(ks[2], (dim, H), jnp.float32),
        "b_fc1": jnp.zeros((1, H), jnp.float32),
        "w_fc2": std * jax.random.normal(ks[3], (H, dim), jnp.float32),
        "b_fc2": jnp.zeros((1, dim), jnp.float32),
    }


def block_reference(x, params, *, num_heads, eps=1e-5):
    """Pure-JAX f32 reference mirroring the PyTorch module (is_mask=0, eval mode)."""
    B, N, C = x.shape
    hd = C // num_heads
    scale = hd ** (-0.5)

    def ln(v, g, b):
        m = jnp.mean(v, axis=-1, keepdims=True)
        var = jnp.mean(jnp.square(v - m), axis=-1, keepdims=True)
        return (v - m) / jnp.sqrt(var + eps) * g + b

    xn = ln(x, params["ln1_g"], params["ln1_b"])
    qkv = (xn @ params["w_qkv"]).reshape(B, N, 3, num_heads, hd).transpose(2, 0, 3, 1, 4)
    q, k, v = qkv[0], qkv[1], qkv[2]
    attn = jax.nn.softmax((q @ jnp.swapaxes(k, -2, -1)) * scale, axis=-1)
    ctx = (attn @ v).transpose(0, 2, 1, 3).reshape(B, N, C)
    x1 = x + ctx @ params["w_proj"] + params["b_proj"]
    x2n = ln(x1, params["ln2_g"], params["ln2_b"])
    h1 = x2n @ params["w_fc1"] + params["b_fc1"]
    h1 = h1 * 0.5 * (1.0 + lax.erf(h1 / math.sqrt(2.0)))
    return x1 + h1 @ params["w_fc2"] + params["b_fc2"]


if __name__ == "__main__":
    # Small shapes consistent with the module: (B, N, C) tokens.
    B, N, C = 2, 16, 64
    num_heads = 4          # head_dim = 16

    key = jax.random.PRNGKey(0)
    kx, kp = jax.random.split(key)
    x = jax.random.normal(kx, (B, N, C), jnp.float32)
    params = init_params(kp, C, mlp_ratio=4.0)

    # One-time weight repack (scale fold + bf16 cast), outside the per-step path.
    prep = prepare_block_params(params, num_heads=num_heads)

    # epoch is irrelevant (is_mask=0 => mask branch never taken).
    out = jax.block_until_ready(block_forward(x, prep, num_heads=num_heads))
    assert out.shape == (B, N, C)
    assert bool(jnp.all(jnp.isfinite(out)))

    # Tolerance check vs the f32 reference (bf16 matmul inputs => not bit-exact).
    ref = block_reference(x, params, num_heads=num_heads)
    err = float(jnp.max(jnp.abs(out - ref)))
    assert err < 5e-2, f"max abs error vs reference: {err}"
    print("KERNEL_OK")
</pallas_src>

<mosaic_0001>
module attributes {stable_mosaic.version = 11 : i64} {
  func.func @block_kernel(%arg0: i32, %arg1: memref<1x16x64xf32, #tpu.memory_space<vmem>>, %arg2: memref<1x64xf32, #tpu.memory_space<vmem>>, %arg3: memref<1x64xf32, #tpu.memory_space<vmem>>, %arg4: memref<64x192xbf16, #tpu.memory_space<vmem>>, %arg5: memref<64x64xbf16, #tpu.memory_space<vmem>>, %arg6: memref<1x64xf32, #tpu.memory_space<vmem>>, %arg7: memref<1x64xf32, #tpu.memory_space<vmem>>, %arg8: memref<1x64xf32, #tpu.memory_space<vmem>>, %arg9: memref<64x256xbf16, #tpu.memory_space<vmem>>, %arg10: memref<1x256xf32, #tpu.memory_space<vmem>>, %arg11: memref<256x64xbf16, #tpu.memory_space<vmem>>, %arg12: memref<1x64xf32, #tpu.memory_space<vmem>>, %arg13: memref<1x16x64xf32, #tpu.memory_space<vmem>>, %arg14: memref<16x192xbf16, #tpu.memory_space<vmem>>, %arg15: memref<16x64xbf16, #tpu.memory_space<vmem>>) attributes {dimension_semantics = [#tpu.dimension_semantics<parallel>], iteration_bounds = array<i64: 2>, scalar_prefetch = 0 : i64, scratch_operands = 2 : i64, tpu.core_type = #tpu.core_type<tc>, window_params = [{transform_indices = @transform_0, window_bounds = array<i64: 1, 16, 64>}, {pipeline_mode = #tpu.pipeline_mode<synchronous>, transform_indices = @transform_1, window_bounds = array<i64: 1, 64>}, {pipeline_mode = #tpu.pipeline_mode<synchronous>, transform_indices = @transform_2, window_bounds = array<i64: 1, 64>}, {pipeline_mode = #tpu.pipeline_mode<synchronous>, transform_indices = @transform_3, window_bounds = array<i64: 64, 192>}, {pipeline_mode = #tpu.pipeline_mode<synchronous>, transform_indices = @transform_4, window_bounds = array<i64: 64, 64>}, {pipeline_mode = #tpu.pipeline_mode<synchronous>, transform_indices = @transform_5, window_bounds = array<i64: 1, 64>}, {pipeline_mode = #tpu.pipeline_mode<synchronous>, transform_indices = @transform_6, window_bounds = array<i64: 1, 64>}, {pipeline_mode = #tpu.pipeline_mode<synchronous>, transform_indices = @transform_7, window_bounds = array<i64: 1, 64>}, {pipeline_mode = #tpu.pipeline_mode<synchronous>, transform_indices = @transform_8, window_bounds = array<i64: 64, 256>}, {pipeline_mode = #tpu.pipeline_mode<synchronous>, transform_indices = @transform_9, window_bounds = array<i64: 1, 256>}, {pipeline_mode = #tpu.pipeline_mode<synchronous>, transform_indices = @transform_10, window_bounds = array<i64: 256, 64>}, {pipeline_mode = #tpu.pipeline_mode<synchronous>, transform_indices = @transform_11, window_bounds = array<i64: 1, 64>}, {transform_indices = @transform_12, window_bounds = array<i64: 1, 16, 64>}]} {
    %c0 = arith.constant 0 : index
    %c0_0 = arith.constant 0 : index
    %c0_1 = arith.constant 0 : index
    %0 = vector.load %arg1[%c0, %c0_0, %c0_1] : memref<1x16x64xf32, #tpu.memory_space<vmem>>, vector<1x16x64xf32>
    %1 = vector.shape_cast %0 : vector<1x16x64xf32> to vector<16x64xf32>
    %c0_2 = arith.constant 0 : index
    %c0_3 = arith.constant 0 : index
    %2 = vector.load %arg2[%c0_2, %c0_3] : memref<1x64xf32, #tpu.memory_space<vmem>>, vector<1x64xf32>
    %c0_4 = arith.constant 0 : index
    %c0_5 = arith.constant 0 : index
    %3 = vector.load %arg3[%c0_4, %c0_5] : memref<1x64xf32, #tpu.memory_space<vmem>>, vector<1x64xf32>
    %cst = arith.constant dense<0.000000e+00> : vector<16xf32>
    %4 = vector.multi_reduction <add>, %1, %cst [1] : vector<16x64xf32> to vector<16xf32>
    %5 = vector.shape_cast %4 : vector<16xf32> to vector<16x1xf32>
    %cst_6 = arith.constant 6.400000e+01 : f32
    %6 = vector.broadcast %cst_6 : f32 to vector<16x1xf32>
    %7 = arith.divf %5, %6 : vector<16x1xf32>
    %8 = vector.broadcast %7 : vector<16x1xf32> to vector<16x64xf32>
    %9 = arith.subf %1, %8 : vector<16x64xf32>
    %10 = arith.mulf %9, %9 : vector<16x64xf32>
    %cst_7 = arith.constant dense<0.000000e+00> : vector<16xf32>
    %11 = vector.multi_reduction <add>, %10, %cst_7 [1] : vector<16x64xf32> to vector<16xf32>
    %12 = vector.shape_cast %11 : vector<16xf32> to vector<16x1xf32>
    %cst_8 = arith.constant 6.400000e+01 : f32
    %13 = vector.broadcast %cst_8 : f32 to vector<16x1xf32>
    %14 = arith.divf %12, %13 : vector<16x1xf32>
    %15 = vector.broadcast %7 : vector<16x1xf32> to vector<16x64xf32>
    %16 = arith.subf %1, %15 : vector<16x64xf32>
    %cst_9 = arith.constant 9.99999974E-6 : f32
    %17 = vector.broadcast %cst_9 : f32 to vector<16x1xf32>
    %18 = arith.addf %14, %17 : vector<16x1xf32>
    %19 = math.rsqrt %18 : vector<16x1xf32>
    %20 = vector.broadcast %19 : vector<16x1xf32> to vector<16x64xf32>
    %21 = arith.mulf %16, %20 : vector<16x64xf32>
    %22 = vector.broadcast %2 : vector<1x64xf32> to vector<16x64xf32>
    %23 = arith.mulf %21, %22 : vector<16x64xf32>
    %24 = vector.broadcast %3 : vector<1x64xf32> to vector<16x64xf32>
    %25 = arith.addf %23, %24 : vector<16x64xf32>
    %26 = arith.truncf %25 : vector<16x64xf32> to vector<16x64xbf16>
    %c0_10 = arith.constant 0 : index
    %c0_11 = arith.constant 0 : index
    %27 = vector.load %arg4[%c0_10, %c0_11] : memref<64x192xbf16, #tpu.memory_space<vmem>>, vector<64x192xbf16>
    %cst_12 = arith.constant dense<0.000000e+00> : vector<16x192xf32>
    %28 = tpu.matmul %26, %27, %cst_12 {dimension_numbers = #tpu.dot_dimension_numbers<[1], [0], [0], [1], [0, 0, 1, 1], [], []>} : vector<16x64xbf16>, vector<64x192xbf16>, vector<16x192xf32> -> vector<16x192xf32>
    %29 = arith.truncf %28 : vector<16x192xf32> to vector<16x192xbf16>
    %c0_13 = arith.constant 0 : index
    %c0_14 = arith.constant 0 : index
    %30 = vector.load %arg14[%c0_13, %c0_14] : memref<16x192xbf16, #tpu.memory_space<vmem>>, vector<16x192xbf16>
    tpu.vector_store %arg14[%c0_13, %c0_14], %29 {strides = array<i32>} : memref<16x192xbf16, #tpu.memory_space<vmem>>, vector<16x192xbf16>,
    %c0_15 = arith.constant 0 : index
    %c0_16 = arith.constant 0 : index
    %31 = vector.load %arg14[%c0_15, %c0_16] : memref<16x192xbf16, #tpu.memory_space<vmem>>, vector<16x16xbf16>
    %c0_17 = arith.constant 0 : index
    %c64 = arith.constant 64 : index
    %32 = vector.load %arg14[%c0_17, %c64] : memref<16x192xbf16, #tpu.memory_space<vmem>>, vector<16x16xbf16>
    %c0_18 = arith.constant 0 : index
    %c128 = arith.constant 128 : index
    %33 = vector.load %arg14[%c0_18, %c128] : memref<16x192xbf16, #tpu.memory_space<vmem>>, vector<16x16xbf16>
    %cst_19 = arith.constant dense<0.000000e+00> : vector<16x16xf32>
    %34 = tpu.matmul %31, %32, %cst_19 {dimension_numbers = #tpu.dot_dimension_numbers<[1], [1], [0], [0], [0, 0, 1, 0], [], []>} : vector<16x16xbf16>, vector<16x16xbf16>, vector<16x16xf32> -> vector<16x16xf32>
    %cst_20 = arith.constant dense<0xFF800000> : vector<16xf32>
    %35 = vector.multi_reduction <maximumf>, %34, %cst_20 [1] : vector<16x16xf32> to vector<16xf32>
    %36 = vector.shape_cast %35 : vector<16xf32> to vector<16x1xf32>
    %37 = vector.broadcast %36 : vector<16x1xf32> to vector<16x16xf32>
    %38 = arith.subf %34, %37 : vector<16x16xf32>
    %39 = math.exp %38 : vector<16x16xf32>
    %cst_21 = arith.constant dense<0.000000e+00> : vector<16xf32>
    %40 = vector.multi_reduction <add>, %39, %cst_21 [1] : vector<16x16xf32> to vector<16xf32>
    %41 = vector.shape_cast %40 : vector<16xf32> to vector<16x1xf32>
    %42 = tpu.reciprocal %41 {approx = true} : vector<16x1xf32> -> vector<16x1xf32>
    %43 = vector.broadcast %42 : vector<16x1xf32> to vector<16x16xf32>
    %44 = arith.mulf %39, %43 : vector<16x16xf32>
    %45 = arith.truncf %44 : vector<16x16xf32> to vector<16x16xbf16>
    %cst_22 = arith.constant dense<0.000000e+00> : vector<16x16xf32>
    %46 = tpu.matmul %45, %33, %cst_22 {dimension_numbers = #tpu.dot_dimension_numbers<[1], [0], [0], [1], [0, 0, 1, 1], [], []>} : vector<16x16xbf16>, vector<16x16xbf16>, vector<16x16xf32> -> vector<16x16xf32>
    %47 = arith.truncf %46 : vector<16x16xf32> to vector<16x16xbf16>
    %c0_23 = arith.constant 0 : index
    %c0_24 = arith.constant 0 : index
    %48 = vector.load %arg15[%c0_23, %c0_24] : memref<16x64xbf16, #tpu.memory_space<vmem>>, vector<16x16xbf16>
    tpu.vector_store %arg15[%c0_23, %c0_24], %47 {strides = array<i32>} : memref<16x64xbf16, #tpu.memory_space<vmem>>, vector<16x16xbf16>,
    %c0_25 = arith.constant 0 : index
    %c16 = arith.constant 16 : index
    %49 = vector.load %arg14[%c0_25, %c16] : memref<16x192xbf16, #tpu.memory_space<vmem>>, vector<16x16xbf16>
    %c0_26 = arith.constant 0 : index
    %c80 = arith.constant 80 : index
    %50 = vector.load %arg14[%c0_26, %c80] : memref<16x192xbf16, #tpu.memory_space<vmem>>, vector<16x16xbf16>
    %c0_27 = arith.constant 0 : index
    %c144 = arith.constant 144 : index
    %51 = vector.load %arg14[%c0_27, %c144] : memref<16x192xbf16, #tpu.memory_space<vmem>>, vector<16x16xbf16>
    %cst_28 = arith.constant dense<0.000000e+00> : vector<16x16xf32>
    %52 = tpu.matmul %49, %50, %cst_28 {dimension_numbers = #tpu.dot_dimension_numbers<[1], [1], [0], [0], [0, 0, 1, 0], [], []>} : vector<16x16xbf16>, vector<16x16xbf16>, vector<16x16xf32> -> vector<16x16xf32>
    %cst_29 = arith.constant dense<0xFF800000> : vector<16xf32>
    %53 = vector.multi_reduction <maximumf>, %52, %cst_29 [1] : vector<16x16xf32> to vector<16xf32>
    %54 = vector.shape_cast %53 : vector<16xf32> to vector<16x1xf32>
    %55 = vector.broadcast %54 : vector<16x1xf32> to vector<16x16xf32>
    %56 = arith.subf %52, %55 : vector<16x16xf32>
    %57 = math.exp %56 : vector<16x16xf32>
    %cst_30 = arith.constant dense<0.000000e+00> : vector<16xf32>
    %58 = vector.multi_reduction <add>, %57, %cst_30 [1] : vector<16x16xf32> to vector<16xf32>
    %59 = vector.shape_cast %58 : vector<16xf32> to vector<16x1xf32>
    %60 = tpu.reciprocal %59 {approx = true} : vector<16x1xf32> -> vector<16x1xf32>
    %61 = vector.broadcast %60 : vector<16x1xf32> to vector<16x16xf32>
    %62 = arith.mulf %57, %61 : vector<16x16xf32>
    %63 = arith.truncf %62 : vector<16x16xf32> to vector<16x16xbf16>
    %cst_31 = arith.constant dense<0.000000e+00> : vector<16x16xf32>
    %64 = tpu.matmul %63, %51, %cst_31 {dimension_numbers = #tpu.dot_dimension_numbers<[1], [0], [0], [1], [0, 0, 1, 1], [], []>} : vector<16x16xbf16>, vector<16x16xbf16>, vector<16x16xf32> -> vector<16x16xf32>
    %65 = arith.truncf %64 : vector<16x16xf32> to vector<16x16xbf16>
    %c0_32 = arith.constant 0 : index
    %c16_33 = arith.constant 16 : index
    %66 = vector.load %arg15[%c0_32, %c16_33] : memref<16x64xbf16, #tpu.memory_space<vmem>>, vector<16x16xbf16>
    tpu.vector_store %arg15[%c0_32, %c16_33], %65 {strides = array<i32>} : memref<16x64xbf16, #tpu.memory_space<vmem>>, vector<16x16xbf16>,
    %c0_34 = arith.constant 0 : index
    %c32 = arith.constant 32 : index
    %67 = vector.load %arg14[%c0_34, %c32] : memref<16x192xbf16, #tpu.memory_space<vmem>>, vector<16x16xbf16>
    %c0_35 = arith.constant 0 : index
    %c96 = arith.constant 96 : index
    %68 = vector.load %arg14[%c0_35, %c96] : memref<16x192xbf16, #tpu.memory_space<vmem>>, vector<16x16xbf16>
    %c0_36 = arith.constant 0 : index
    %c160 = arith.constant 160 : index
    %69 = vector.load %arg14[%c0_36, %c160] : memref<16x192xbf16, #tpu.memory_space<vmem>>, vector<16x16xbf16>
    %cst_37 = arith.constant dense<0.000000e+00> : vector<16x16xf32>
    %70 = tpu.matmul %67, %68, %cst_37 {dimension_numbers = #tpu.dot_dimension_numbers<[1], [1], [0], [0], [0, 0, 1, 0], [], []>} : vector<16x16xbf16>, vector<16x16xbf16>, vector<16x16xf32> -> vector<16x16xf32>
    %cst_38 = arith.constant dense<0xFF800000> : vector<16xf32>
    %71 = vector.multi_reduction <maximumf>, %70, %cst_38 [1] : vector<16x16xf32> to vector<16xf32>
    %72 = vector.shape_cast %71 : vector<16xf32> to vector<16x1xf32>
    %73 = vector.broadcast %72 : vector<16x1xf32> to vector<16x16xf32>
    %74 = arith.subf %70, %73 : vector<16x16xf32>
    %75 = math.exp %74 : vector<16x16xf32>
    %cst_39 = arith.constant dense<0.000000e+00> : vector<16xf32>
    %76 = vector.multi_reduction <add>, %75, %cst_39 [1] : vector<16x16xf32> to vector<16xf32>
    %77 = vector.shape_cast %76 : vector<16xf32> to vector<16x1xf32>
    %78 = tpu.reciprocal %77 {approx = true} : vector<16x1xf32> -> vector<16x1xf32>
    %79 = vector.broadcast %78 : vector<16x1xf32> to vector<16x16xf32>
    %80 = arith.mulf %75, %79 : vector<16x16xf32>
    %81 = arith.truncf %80 : vector<16x16xf32> to vector<16x16xbf16>
    %cst_40 = arith.constant dense<0.000000e+00> : vector<16x16xf32>
    %82 = tpu.matmul %81, %69, %cst_40 {dimension_numbers = #tpu.dot_dimension_numbers<[1], [0], [0], [1], [0, 0, 1, 1], [], []>} : vector<16x16xbf16>, vector<16x16xbf16>, vector<16x16xf32> -> vector<16x16xf32>
    %83 = arith.truncf %82 : vector<16x16xf32> to vector<16x16xbf16>
    %c0_41 = arith.constant 0 : index
    %c32_42 = arith.constant 32 : index
    %84 = vector.load %arg15[%c0_41, %c32_42] : memref<16x64xbf16, #tpu.memory_space<vmem>>, vector<16x16xbf16>
    tpu.vector_store %arg15[%c0_41, %c32_42], %83 {strides = array<i32>} : memref<16x64xbf16, #tpu.memory_space<vmem>>, vector<16x16xbf16>,
    %c0_43 = arith.constant 0 : index
    %c48 = arith.constant 48 : index
    %85 = vector.load %arg14[%c0_43, %c48] : memref<16x192xbf16, #tpu.memory_space<vmem>>, vector<16x16xbf16>
    %c0_44 = arith.constant 0 : index
    %c112 = arith.constant 112 : index
    %86 = vector.load %arg14[%c0_44, %c112] : memref<16x192xbf16, #tpu.memory_space<vmem>>, vector<16x16xbf16>
    %c0_45 = arith.constant 0 : index
    %c176 = arith.constant 176 : index
    %87 = vector.load %arg14[%c0_45, %c176] : memref<16x192xbf16, #tpu.memory_space<vmem>>, vector<16x16xbf16>
    %cst_46 = arith.constant dense<0.000000e+00> : vector<16x16xf32>
    %88 = tpu.matmul %85, %86, %cst_46 {dimension_numbers = #tpu.dot_dimension_numbers<[1], [1], [0], [0], [0, 0, 1, 0], [], []>} : vector<16x16xbf16>, vector<16x16xbf16>, vector<16x16xf32> -> vector<16x16xf32>
    %cst_47 = arith.constant dense<0xFF800000> : vector<16xf32>
    %89 = vector.multi_reduction <maximumf>, %88, %cst_47 [1] : vector<16x16xf32> to vector<16xf32>
    %90 = vector.shape_cast %89 : vector<16xf32> to vector<16x1xf32>
    %91 = vector.broadcast %90 : vector<16x1xf32> to vector<16x16xf32>
    %92 = arith.subf %88, %91 : vector<16x16xf32>
    %93 = math.exp %92 : vector<16x16xf32>
    %cst_48 = arith.constant dense<0.000000e+00> : vector<16xf32>
    %94 = vector.multi_reduction <add>, %93, %cst_48 [1] : vector<16x16xf32> to vector<16xf32>
    %95 = vector.shape_cast %94 : vector<16xf32> to vector<16x1xf32>
    %96 = tpu.reciprocal %95 {approx = true} : vector<16x1xf32> -> vector<16x1xf32>
    %97 = vector.broadcast %96 : vector<16x1xf32> to vector<16x16xf32>
    %98 = arith.mulf %93, %97 : vector<16x16xf32>
    %99 = arith.truncf %98 : vector<16x16xf32> to vector<16x16xbf16>
    %cst_49 = arith.constant dense<0.000000e+00> : vector<16x16xf32>
    %100 = tpu.matmul %99, %87, %cst_49 {dimension_numbers = #tpu.dot_dimension_numbers<[1], [0], [0], [1], [0, 0, 1, 1], [], []>} : vector<16x16xbf16>, vector<16x16xbf16>, vector<16x16xf32> -> vector<16x16xf32>
    %101 = arith.truncf %100 : vector<16x16xf32> to vector<16x16xbf16>
    %c0_50 = arith.constant 0 : index
    %c48_51 = arith.constant 48 : index
    %102 = vector.load %arg15[%c0_50, %c48_51] : memref<16x64xbf16, #tpu.memory_space<vmem>>, vector<16x16xbf16>
    tpu.vector_store %arg15[%c0_50, %c48_51], %101 {strides = array<i32>} : memref<16x64xbf16, #tpu.memory_space<vmem>>, vector<16x16xbf16>,
    %c0_52 = arith.constant 0 : index
    %c0_53 = arith.constant 0 : index
    %103 = vector.load %arg15[%c0_52, %c0_53] : memref<16x64xbf16, #tpu.memory_space<vmem>>, vector<16x64xbf16>
    %c0_54 = arith.constant 0 : index
    %c0_55 = arith.constant 0 : index
    %104 = vector.load %arg5[%c0_54, %c0_55] : memref<64x64xbf16, #tpu.memory_space<vmem>>, vector<64x64xbf16>
    %cst_56 = arith.constant dense<0.000000e+00> : vector<16x64xf32>
    %105 = tpu.matmul %103, %104, %cst_56 {dimension_numbers = #tpu.dot_dimension_numbers<[1], [0], [0], [1], [0, 0, 1, 1], [], []>} : vector<16x64xbf16>, vector<64x64xbf16>, vector<16x64xf32> -> vector<16x64xf32>
    %c0_57 = arith.constant 0 : index
    %c0_58 = arith.constant 0 : index
    %106 = vector.load %arg6[%c0_57, %c0_58] : memref<1x64xf32, #tpu.memory_space<vmem>>, vector<1x64xf32>
    %107 = vector.broadcast %106 : vector<1x64xf32> to vector<16x64xf32>
    %108 = arith.addf %105, %107 : vector<16x64xf32>
    %109 = arith.addf %1, %108 : vector<16x64xf32>
    %c0_59 = arith.constant 0 : index
    %c0_60 = arith.constant 0 : index
    %110 = vector.load %arg7[%c0_59, %c0_60] : memref<1x64xf32, #tpu.memory_space<vmem>>, vector<1x64xf32>
    %c0_61 = arith.constant 0 : index
    %c0_62 = arith.constant 0 : index
    %111 = vector.load %arg8[%c0_61, %c0_62] : memref<1x64xf32, #tpu.memory_space<vmem>>, vector<1x64xf32>
    %cst_63 = arith.constant dense<0.000000e+00> : vector<16xf32>
    %112 = vector.multi_reduction <add>, %109, %cst_63 [1] : vector<16x64xf32> to vector<16xf32>
    %113 = vector.shape_cast %112 : vector<16xf32> to vector<16x1xf32>
    %cst_64 = arith.constant 6.400000e+01 : f32
    %114 = vector.broadcast %cst_64 : f32 to vector<16x1xf32>
    %115 = arith.divf %113, %114 : vector<16x1xf32>
    %116 = vector.broadcast %115 : vector<16x1xf32> to vector<16x64xf32>
    %117 = arith.subf %109, %116 : vector<16x64xf32>
    %118 = arith.mulf %117, %117 : vector<16x64xf32>
    %cst_65 = arith.constant dense<0.000000e+00> : vector<16xf32>
    %119 = vector.multi_reduction <add>, %118, %cst_65 [1] : vector<16x64xf32> to vector<16xf32>
    %120 = vector.shape_cast %119 : vector<16xf32> to vector<16x1xf32>
    %cst_66 = arith.constant 6.400000e+01 : f32
    %121 = vector.broadcast %cst_66 : f32 to vector<16x1xf32>
    %122 = arith.divf %120, %121 : vector<16x1xf32>
    %123 = vector.broadcast %115 : vector<16x1xf32> to vector<16x64xf32>
    %124 = arith.subf %109, %123 : vector<16x64xf32>
    %cst_67 = arith.constant 9.99999974E-6 : f32
    %125 = vector.broadcast %cst_67 : f32 to vector<16x1xf32>
    %126 = arith.addf %122, %125 : vector<16x1xf32>
    %127 = math.rsqrt %126 : vector<16x1xf32>
    %128 = vector.broadcast %127 : vector<16x1xf32> to vector<16x64xf32>
    %129 = arith.mulf %124, %128 : vector<16x64xf32>
    %130 = vector.broadcast %110 : vector<1x64xf32> to vector<16x64xf32>
    %131 = arith.mulf %129, %130 : vector<16x64xf32>
    %132 = vector.broadcast %111 : vector<1x64xf32> to vector<16x64xf32>
    %133 = arith.addf %131, %132 : vector<16x64xf32>
    %134 = arith.truncf %133 : vector<16x64xf32> to vector<16x64xbf16>
    %c0_68 = arith.constant 0 : index
    %c0_69 = arith.constant 0 : index
    %135 = vector.load %arg9[%c0_68, %c0_69] : memref<64x256xbf16, #tpu.memory_space<vmem>>, vector<64x256xbf16>
    %cst_70 = arith.constant dense<0.000000e+00> : vector<16x256xf32>
    %136 = tpu.matmul %134, %135, %cst_70 {dimension_numbers = #tpu.dot_dimension_numbers<[1], [0], [0], [1], [0, 0, 1, 1], [], []>} : vector<16x64xbf16>, vector<64x256xbf16>, vector<16x256xf32> -> vector<16x256xf32>
    %c0_71 = arith.constant 0 : index
    %c0_72 = arith.constant 0 : index
    %137 = vector.load %arg10[%c0_71, %c0_72] : memref<1x256xf32, #tpu.memory_space<vmem>>, vector<1x256xf32>
    %138 = vector.broadcast %137 : vector<1x256xf32> to vector<16x256xf32>
    %139 = arith.addf %136, %138 : vector<16x256xf32>
    %cst_73 = arith.constant 5.000000e-01 : f32
    %140 = vector.broadcast %cst_73 : f32 to vector<16x256xf32>
    %141 = arith.mulf %139, %140 : vector<16x256xf32>
    %cst_74 = arith.constant 1.41421354 : f32
    %142 = vector.broadcast %cst_74 : f32 to vector<16x256xf32>
    %143 = arith.divf %139, %142 : vector<16x256xf32>
    %144 = math.erf %143 : vector<16x256xf32>
    %cst_75 = arith.constant 1.000000e+00 : f32
    %145 = vector.broadcast %cst_75 : f32 to vector<16x256xf32>
    %146 = arith.addf %145, %144 : vector<16x256xf32>
    %147 = arith.mulf %141, %146 : vector<16x256xf32>
    %148 = arith.truncf %147 : vector<16x256xf32> to vector<16x256xbf16>
    %c0_76 = arith.constant 0 : index
    %c0_77 = arith.constant 0 : index
    %149 = vector.load %arg11[%c0_76, %c0_77] : memref<256x64xbf16, #tpu.memory_space<vmem>>, vector<256x64xbf16>
    %cst_78 = arith.constant dense<0.000000e+00> : vector<16x64xf32>
    %150 = tpu.matmul %148, %149, %cst_78 {dimension_numbers = #tpu.dot_dimension_numbers<[1], [0], [0], [1], [0, 0, 1, 1], [], []>} : vector<16x256xbf16>, vector<256x64xbf16>, vector<16x64xf32> -> vector<16x64xf32>
    %c0_79 = arith.constant 0 : index
    %c0_80 = arith.constant 0 : index
    %151 = vector.load %arg12[%c0_79, %c0_80] : memref<1x64xf32, #tpu.memory_space<vmem>>, vector<1x64xf32>
    %152 = vector.broadcast %151 : vector<1x64xf32> to vector<16x64xf32>
    %153 = arith.addf %150, %152 : vector<16x64xf32>
    %154 = arith.addf %109, %153 : vector<16x64xf32>
    %155 = vector.shape_cast %154 : vector<16x64xf32> to vector<1x16x64xf32>
    %c0_81 = arith.constant 0 : index
    %c0_82 = arith.constant 0 : index
    %c0_83 = arith.constant 0 : index
    %156 = vector.load %arg13[%c0_81, %c0_82, %c0_83] : memref<1x16x64xf32, #tpu.memory_space<vmem>>, vector<1x16x64xf32>
    tpu.vector_store %arg13[%c0_81, %c0_82, %c0_83], %155 {strides = array<i32>} : memref<1x16x64xf32, #tpu.memory_space<vmem>>, vector<1x16x64xf32>,
    return
  }
  func.func @transform_0(%arg0: i32) -> (i32, i32, i32) {
    %c0_i32 = arith.constant 0 : i32
    %c0_i32_0 = arith.constant 0 : i32
    %c0_i32_1 = arith.constant 0 : i32
    return %arg0, %c0_i32, %c0_i32_0 : i32, i32, i32
  }
  func.func @transform_1(%arg0: i32) -> (i32, i32) {
    %c0_i32 = arith.constant 0 : i32
    %c0_i32_0 = arith.constant 0 : i32
    %c0_i32_1 = arith.constant 0 : i32
    return %c0_i32, %c0_i32_0 : i32, i32
  }
  func.func @transform_2(%arg0: i32) -> (i32, i32) {
    %c0_i32 = arith.constant 0 : i32
    %c0_i32_0 = arith.constant 0 : i32
    %c0_i32_1 = arith.constant 0 : i32
    return %c0_i32, %c0_i32_0 : i32, i32
  }
  func.func @transform_3(%arg0: i32) -> (i32, i32) {
    %c0_i32 = arith.constant 0 : i32
    %c0_i32_0 = arith.constant 0 : i32
    %c0_i32_1 = arith.constant 0 : i32
    return %c0_i32, %c0_i32_0 : i32, i32
  }
  func.func @transform_4(%arg0: i32) -> (i32, i32) {
    %c0_i32 = arith.constant 0 : i32
    %c0_i32_0 = arith.constant 0 : i32
    %c0_i32_1 = arith.constant 0 : i32
    return %c0_i32, %c0_i32_0 : i32, i32
  }
  func.func @transform_5(%arg0: i32) -> (i32, i32) {
    %c0_i32 = arith.constant 0 : i32
    %c0_i32_0 = arith.constant 0 : i32
    %c0_i32_1 = arith.constant 0 : i32
    return %c0_i32, %c0_i32_0 : i32, i32
  }
  func.func @transform_6(%arg0: i32) -> (i32, i32) {
    %c0_i32 = arith.constant 0 : i32
    %c0_i32_0 = arith.constant 0 : i32
    %c0_i32_1 = arith.constant 0 : i32
    return %c0_i32, %c0_i32_0 : i32, i32
  }
  func.func @transform_7(%arg0: i32) -> (i32, i32) {
    %c0_i32 = arith.constant 0 : i32
    %c0_i32_0 = arith.constant 0 : i32
    %c0_i32_1 = arith.constant 0 : i32
    return %c0_i32, %c0_i32_0 : i32, i32
  }
  func.func @transform_8(%arg0: i32) -> (i32, i32) {
    %c0_i32 = arith.constant 0 : i32
    %c0_i32_0 = arith.constant 0 : i32
    %c0_i32_1 = arith.constant 0 : i32
    return %c0_i32, %c0_i32_0 : i32, i32
  }
  func.func @transform_9(%arg0: i32) -> (i32, i32) {
    %c0_i32 = arith.constant 0 : i32
    %c0_i32_0 = arith.constant 0 : i32
    %c0_i32_1 = arith.constant 0 : i32
    return %c0_i32, %c0_i32_0 : i32, i32
  }
  func.func @transform_10(%arg0: i32) -> (i32, i32) {
    %c0_i32 = arith.constant 0 : i32
    %c0_i32_0 = arith.constant 0 : i32
    %c0_i32_1 = arith.constant 0 : i32
    return %c0_i32, %c0_i32_0 : i32, i32
  }
  func.func @transform_11(%arg0: i32) -> (i32, i32) {
    %c0_i32 = arith.constant 0 : i32
    %c0_i32_0 = arith.constant 0 : i32
    %c0_i32_1 = arith.constant 0 : i32
    return %c0_i32, %c0_i32_0 : i32, i32
  }
  func.func @transform_12(%arg0: i32) -> (i32, i32, i32) {
    %c0_i32 = arith.constant 0 : i32
    %c0_i32_0 = arith.constant 0 : i32
    %c0_i32_1 = arith.constant 0 : i32
    return %arg0, %c0_i32, %c0_i32_0 : i32, i32, i32
  }
}

module attributes {stable_mosaic.version = 11 : i64} {
  func.func @block_kernel(%arg0: i32, %arg1: memref<1x16x64xf32, #tpu.memory_space<vmem>>, %arg2: memref<1x64xf32, #tpu.memory_space<vmem>>, %arg3: memref<1x64xf32, #tpu.memory_space<vmem>>, %arg4: memref<64x192xbf16, #tpu.memory_space<vmem>>, %arg5: memref<64x64xbf16, #tpu.memory_space<vmem>>, %arg6: memref<1x64xf32, #tpu.memory_space<vmem>>, %arg7: memref<1x64xf32, #tpu.memory_space<vmem>>, %arg8: memref<1x64xf32, #tpu.memory_space<vmem>>, %arg9: memref<64x256xbf16, #tpu.memory_space<vmem>>, %arg10: memref<1x256xf32, #tpu.memory_space<vmem>>, %arg11: memref<256x64xbf16, #tpu.memory_space<vmem>>, %arg12: memref<1x64xf32, #tpu.memory_space<vmem>>, %arg13: memref<1x16x64xf32, #tpu.memory_space<vmem>>, %arg14: memref<16x192xbf16, #tpu.memory_space<vmem>>, %arg15: memref<16x64xbf16, #tpu.memory_space<vmem>>) attributes {dimension_semantics = [#tpu.dimension_semantics<parallel>], iteration_bounds = array<i64: 2>, scalar_prefetch = 0 : i64, scratch_operands = 2 : i64, tpu.core_type = #tpu.core_type<tc>, window_params = [{transform_indices = @transform_0, window_bounds = array<i64: 1, 16, 64>}, {pipeline_mode = #tpu.pipeline_mode<synchronous>, transform_indices = @transform_1, window_bounds = array<i64: 1, 64>}, {pipeline_mode = #tpu.pipeline_mode<synchronous>, transform_indices = @transform_2, window_bounds = array<i64: 1, 64>}, {pipeline_mode = #tpu.pipeline_mode<synchronous>, transform_indices = @transform_3, window_bounds = array<i64: 64, 192>}, {pipeline_mode = #tpu.pipeline_mode<synchronous>, transform_indices = @transform_4, window_bounds = array<i64: 64, 64>}, {pipeline_mode = #tpu.pipeline_mode<synchronous>, transform_indices = @transform_5, window_bounds = array<i64: 1, 64>}, {pipeline_mode = #tpu.pipeline_mode<synchronous>, transform_indices = @transform_6, window_bounds = array<i64: 1, 64>}, {pipeline_mode = #tpu.pipeline_mode<synchronous>, transform_indices = @transform_7, window_bounds = array<i64: 1, 64>}, {pipeline_mode = #tpu.pipeline_mode<synchronous>, transform_indices = @transform_8, window_bounds = array<i64: 64, 256>}, {pipeline_mode = #tpu.pipeline_mode<synchronous>, transform_indices = @transform_9, window_bounds = array<i64: 1, 256>}, {pipeline_mode = #tpu.pipeline_mode<synchronous>, transform_indices = @transform_10, window_bounds = array<i64: 256, 64>}, {pipeline_mode = #tpu.pipeline_mode<synchronous>, transform_indices = @transform_11, window_bounds = array<i64: 1, 64>}, {transform_indices = @transform_12, window_bounds = array<i64: 1, 16, 64>}]} {
    %c0 = arith.constant 0 : index
    %c0_0 = arith.constant 0 : index
    %c0_1 = arith.constant 0 : index
    %0 = vector.load %arg1[%c0, %c0_0, %c0_1] : memref<1x16x64xf32, #tpu.memory_space<vmem>>, vector<1x16x64xf32>
    %1 = vector.shape_cast %0 : vector<1x16x64xf32> to vector<16x64xf32>
    %c0_2 = arith.constant 0 : index
    %c0_3 = arith.constant 0 : index
    %2 = vector.load %arg2[%c0_2, %c0_3] : memref<1x64xf32, #tpu.memory_space<vmem>>, vector<1x64xf32>
    %c0_4 = arith.constant 0 : index
    %c0_5 = arith.constant 0 : index
    %3 = vector.load %arg3[%c0_4, %c0_5] : memref<1x64xf32, #tpu.memory_space<vmem>>, vector<1x64xf32>
    %cst = arith.constant dense<0.000000e+00> : vector<16xf32>
    %4 = vector.multi_reduction <add>, %1, %cst [1] : vector<16x64xf32> to vector<16xf32>
    %5 = vector.shape_cast %4 : vector<16xf32> to vector<16x1xf32>
    %cst_6 = arith.constant 6.400000e+01 : f32
    %6 = vector.broadcast %cst_6 : f32 to vector<16x1xf32>
    %7 = arith.divf %5, %6 : vector<16x1xf32>
    %8 = vector.broadcast %7 : vector<16x1xf32> to vector<16x64xf32>
    %9 = arith.subf %1, %8 : vector<16x64xf32>
    %10 = arith.mulf %9, %9 : vector<16x64xf32>
    %cst_7 = arith.constant dense<0.000000e+00> : vector<16xf32>
    %11 = vector.multi_reduction <add>, %10, %cst_7 [1] : vector<16x64xf32> to vector<16xf32>
    %12 = vector.shape_cast %11 : vector<16xf32> to vector<16x1xf32>
    %cst_8 = arith.constant 6.400000e+01 : f32
    %13 = vector.broadcast %cst_8 : f32 to vector<16x1xf32>
    %14 = arith.divf %12, %13 : vector<16x1xf32>
    %15 = vector.broadcast %7 : vector<16x1xf32> to vector<16x64xf32>
    %16 = arith.subf %1, %15 : vector<16x64xf32>
    %cst_9 = arith.constant 9.99999974E-6 : f32
    %17 = vector.broadcast %cst_9 : f32 to vector<16x1xf32>
    %18 = arith.addf %14, %17 : vector<16x1xf32>
    %19 = math.rsqrt %18 : vector<16x1xf32>
    %20 = vector.broadcast %19 : vector<16x1xf32> to vector<16x64xf32>
    %21 = arith.mulf %16, %20 : vector<16x64xf32>
    %22 = vector.broadcast %2 : vector<1x64xf32> to vector<16x64xf32>
    %23 = arith.mulf %21, %22 : vector<16x64xf32>
    %24 = vector.broadcast %3 : vector<1x64xf32> to vector<16x64xf32>
    %25 = arith.addf %23, %24 : vector<16x64xf32>
    %26 = arith.truncf %25 : vector<16x64xf32> to vector<16x64xbf16>
    %c0_10 = arith.constant 0 : index
    %c0_11 = arith.constant 0 : index
    %27 = vector.load %arg4[%c0_10, %c0_11] : memref<64x192xbf16, #tpu.memory_space<vmem>>, vector<64x192xbf16>
    %cst_12 = arith.constant dense<0.000000e+00> : vector<16x192xf32>
    %28 = tpu.matmul %26, %27, %cst_12 {dimension_numbers = #tpu.dot_dimension_numbers<[1], [0], [0], [1], [0, 0, 1, 1], [], []>} : vector<16x64xbf16>, vector<64x192xbf16>, vector<16x192xf32> -> vector<16x192xf32>
    %29 = arith.truncf %28 : vector<16x192xf32> to vector<16x192xbf16>
    %c0_13 = arith.constant 0 : index
    %c0_14 = arith.constant 0 : index
    %30 = vector.load %arg14[%c0_13, %c0_14] : memref<16x192xbf16, #tpu.memory_space<vmem>>, vector<16x192xbf16>
    tpu.vector_store %arg14[%c0_13, %c0_14], %29 {strides = array<i32>} : memref<16x192xbf16, #tpu.memory_space<vmem>>, vector<16x192xbf16>,
    %c0_15 = arith.constant 0 : index
    %c0_16 = arith.constant 0 : index
    %31 = vector.load %arg14[%c0_15, %c0_16] : memref<16x192xbf16, #tpu.memory_space<vmem>>, vector<16x16xbf16>
    %c0_17 = arith.constant 0 : index
    %c64 = arith.constant 64 : index
    %32 = vector.load %arg14[%c0_17, %c64] : memref<16x192xbf16, #tpu.memory_space<vmem>>, vector<16x16xbf16>
    %c0_18 = arith.constant 0 : index
    %c128 = arith.constant 128 : index
    %33 = vector.load %arg14[%c0_18, %c128] : memref<16x192xbf16, #tpu.memory_space<vmem>>, vector<16x16xbf16>
    %cst_19 = arith.constant dense<0.000000e+00> : vector<16x16xf32>
    %34 = tpu.matmul %31, %32, %cst_19 {dimension_numbers = #tpu.dot_dimension_numbers<[1], [1], [0], [0], [0, 0, 1, 0], [], []>} : vector<16x16xbf16>, vector<16x16xbf16>, vector<16x16xf32> -> vector<16x16xf32>
    %cst_20 = arith.constant dense<0xFF800000> : vector<16xf32>
    %35 = vector.multi_reduction <maximumf>, %34, %cst_20 [1] : vector<16x16xf32> to vector<16xf32>
    %36 = vector.shape_cast %35 : vector<16xf32> to vector<16x1xf32>
    %37 = vector.broadcast %36 : vector<16x1xf32> to vector<16x16xf32>
    %38 = arith.subf %34, %37 : vector<16x16xf32>
    %39 = math.exp %38 : vector<16x16xf32>
    %cst_21 = arith.constant dense<0.000000e+00> : vector<16xf32>
    %40 = vector.multi_reduction <add>, %39, %cst_21 [1] : vector<16x16xf32> to vector<16xf32>
    %41 = vector.shape_cast %40 : vector<16xf32> to vector<16x1xf32>
    %42 = tpu.reciprocal %41 {approx = true} : vector<16x1xf32> -> vector<16x1xf32>
    %43 = vector.broadcast %42 : vector<16x1xf32> to vector<16x16xf32>
    %44 = arith.mulf %39, %43 : vector<16x16xf32>
    %45 = arith.truncf %44 : vector<16x16xf32> to vector<16x16xbf16>
    %cst_22 = arith.constant dense<0.000000e+00> : vector<16x16xf32>
    %46 = tpu.matmul %45, %33, %cst_22 {dimension_numbers = #tpu.dot_dimension_numbers<[1], [0], [0], [1], [0, 0, 1, 1], [], []>} : vector<16x16xbf16>, vector<16x16xbf16>, vector<16x16xf32> -> vector<16x16xf32>
    %47 = arith.truncf %46 : vector<16x16xf32> to vector<16x16xbf16>
    %c0_23 = arith.constant 0 : index
    %c0_24 = arith.constant 0 : index
    %48 = vector.load %arg15[%c0_23, %c0_24] : memref<16x64xbf16, #tpu.memory_space<vmem>>, vector<16x16xbf16>
    tpu.vector_store %arg15[%c0_23, %c0_24], %47 {strides = array<i32>} : memref<16x64xbf16, #tpu.memory_space<vmem>>, vector<16x16xbf16>,
    %c0_25 = arith.constant 0 : index
    %c16 = arith.constant 16 : index
    %49 = vector.load %arg14[%c0_25, %c16] : memref<16x192xbf16, #tpu.memory_space<vmem>>, vector<16x16xbf16>
    %c0_26 = arith.constant 0 : index
    %c80 = arith.constant 80 : index
    %50 = vector.load %arg14[%c0_26, %c80] : memref<16x192xbf16, #tpu.memory_space<vmem>>, vector<16x16xbf16>
    %c0_27 = arith.constant 0 : index
    %c144 = arith.constant 144 : index
    %51 = vector.load %arg14[%c0_27, %c144] : memref<16x192xbf16, #tpu.memory_space<vmem>>, vector<16x16xbf16>
    %cst_28 = arith.constant dense<0.000000e+00> : vector<16x16xf32>
    %52 = tpu.matmul %49, %50, %cst_28 {dimension_numbers = #tpu.dot_dimension_numbers<[1], [1], [0], [0], [0, 0, 1, 0], [], []>} : vector<16x16xbf16>, vector<16x16xbf16>, vector<16x16xf32> -> vector<16x16xf32>
    %cst_29 = arith.constant dense<0xFF800000> : vector<16xf32>
    %53 = vector.multi_reduction <maximumf>, %52, %cst_29 [1] : vector<16x16xf32> to vector<16xf32>
    %54 = vector.shape_cast %53 : vector<16xf32> to vector<16x1xf32>
    %55 = vector.broadcast %54 : vector<16x1xf32> to vector<16x16xf32>
    %56 = arith.subf %52, %55 : vector<16x16xf32>
    %57 = math.exp %56 : vector<16x16xf32>
    %cst_30 = arith.constant dense<0.000000e+00> : vector<16xf32>
    %58 = vector.multi_reduction <add>, %57, %cst_30 [1] : vector<16x16xf32> to vector<16xf32>
    %59 = vector.shape_cast %58 : vector<16xf32> to vector<16x1xf32>
    %60 = tpu.reciprocal %59 {approx = true} : vector<16x1xf32> -> vector<16x1xf32>
    %61 = vector.broadcast %60 : vector<16x1xf32> to vector<16x16xf32>
    %62 = arith.mulf %57, %61 : vector<16x16xf32>
    %63 = arith.truncf %62 : vector<16x16xf32> to vector<16x16xbf16>
    %cst_31 = arith.constant dense<0.000000e+00> : vector<16x16xf32>
    %64 = tpu.matmul %63, %51, %cst_31 {dimension_numbers = #tpu.dot_dimension_numbers<[1], [0], [0], [1], [0, 0, 1, 1], [], []>} : vector<16x16xbf16>, vector<16x16xbf16>, vector<16x16xf32> -> vector<16x16xf32>
    %65 = arith.truncf %64 : vector<16x16xf32> to vector<16x16xbf16>
    %c0_32 = arith.constant 0 : index
    %c16_33 = arith.constant 16 : index
    %66 = vector.load %arg15[%c0_32, %c16_33] : memref<16x64xbf16, #tpu.memory_space<vmem>>, vector<16x16xbf16>
    tpu.vector_store %arg15[%c0_32, %c16_33], %65 {strides = array<i32>} : memref<16x64xbf16, #tpu.memory_space<vmem>>, vector<16x16xbf16>,
    %c0_34 = arith.constant 0 : index
    %c32 = arith.constant 32 : index
    %67 = vector.load %arg14[%c0_34, %c32] : memref<16x192xbf16, #tpu.memory_space<vmem>>, vector<16x16xbf16>
    %c0_35 = arith.constant 0 : index
    %c96 = arith.constant 96 : index
    %68 = vector.load %arg14[%c0_35, %c96] : memref<16x192xbf16, #tpu.memory_space<vmem>>, vector<16x16xbf16>
    %c0_36 = arith.constant 0 : index
    %c160 = arith.constant 160 : index
    %69 = vector.load %arg14[%c0_36, %c160] : memref<16x192xbf16, #tpu.memory_space<vmem>>, vector<16x16xbf16>
    %cst_37 = arith.constant dense<0.000000e+00> : vector<16x16xf32>
    %70 = tpu.matmul %67, %68, %cst_37 {dimension_numbers = #tpu.dot_dimension_numbers<[1], [1], [0], [0], [0, 0, 1, 0], [], []>} : vector<16x16xbf16>, vector<16x16xbf16>, vector<16x16xf32> -> vector<16x16xf32>
    %cst_38 = arith.constant dense<0xFF800000> : vector<16xf32>
    %71 = vector.multi_reduction <maximumf>, %70, %cst_38 [1] : vector<16x16xf32> to vector<16xf32>
    %72 = vector.shape_cast %71 : vector<16xf32> to vector<16x1xf32>
    %73 = vector.broadcast %72 : vector<16x1xf32> to vector<16x16xf32>
    %74 = arith.subf %70, %73 : vector<16x16xf32>
    %75 = math.exp %74 : vector<16x16xf32>
    %cst_39 = arith.constant dense<0.000000e+00> : vector<16xf32>
    %76 = vector.multi_reduction <add>, %75, %cst_39 [1] : vector<16x16xf32> to vector<16xf32>
    %77 = vector.shape_cast %76 : vector<16xf32> to vector<16x1xf32>
    %78 = tpu.reciprocal %77 {approx = true} : vector<16x1xf32> -> vector<16x1xf32>
    %79 = vector.broadcast %78 : vector<16x1xf32> to vector<16x16xf32>
    %80 = arith.mulf %75, %79 : vector<16x16xf32>
    %81 = arith.truncf %80 : vector<16x16xf32> to vector<16x16xbf16>
    %cst_40 = arith.constant dense<0.000000e+00> : vector<16x16xf32>
    %82 = tpu.matmul %81, %69, %cst_40 {dimension_numbers = #tpu.dot_dimension_numbers<[1], [0], [0], [1], [0, 0, 1, 1], [], []>} : vector<16x16xbf16>, vector<16x16xbf16>, vector<16x16xf32> -> vector<16x16xf32>
    %83 = arith.truncf %82 : vector<16x16xf32> to vector<16x16xbf16>
    %c0_41 = arith.constant 0 : index
    %c32_42 = arith.constant 32 : index
    %84 = vector.load %arg15[%c0_41, %c32_42] : memref<16x64xbf16, #tpu.memory_space<vmem>>, vector<16x16xbf16>
    tpu.vector_store %arg15[%c0_41, %c32_42], %83 {strides = array<i32>} : memref<16x64xbf16, #tpu.memory_space<vmem>>, vector<16x16xbf16>,
    %c0_43 = arith.constant 0 : index
    %c48 = arith.constant 48 : index
    %85 = vector.load %arg14[%c0_43, %c48] : memref<16x192xbf16, #tpu.memory_space<vmem>>, vector<16x16xbf16>
    %c0_44 = arith.constant 0 : index
    %c112 = arith.constant 112 : index
    %86 = vector.load %arg14[%c0_44, %c112] : memref<16x192xbf16, #tpu.memory_space<vmem>>, vector<16x16xbf16>
    %c0_45 = arith.constant 0 : index
    %c176 = arith.constant 176 : index
    %87 = vector.load %arg14[%c0_45, %c176] : memref<16x192xbf16, #tpu.memory_space<vmem>>, vector<16x16xbf16>
    %cst_46 = arith.constant dense<0.000000e+00> : vector<16x16xf32>
    %88 = tpu.matmul %85, %86, %cst_46 {dimension_numbers = #tpu.dot_dimension_numbers<[1], [1], [0], [0], [0, 0, 1, 0], [], []>} : vector<16x16xbf16>, vector<16x16xbf16>, vector<16x16xf32> -> vector<16x16xf32>
    %cst_47 = arith.constant dense<0xFF800000> : vector<16xf32>
    %89 = vector.multi_reduction <maximumf>, %88, %cst_47 [1] : vector<16x16xf32> to vector<16xf32>
    %90 = vector.shape_cast %89 : vector<16xf32> to vector<16x1xf32>
    %91 = vector.broadcast %90 : vector<16x1xf32> to vector<16x16xf32>
    %92 = arith.subf %88, %91 : vector<16x16xf32>
    %93 = math.exp %92 : vector<16x16xf32>
    %cst_48 = arith.constant dense<0.000000e+00> : vector<16xf32>
    %94 = vector.multi_reduction <add>, %93, %cst_48 [1] : vector<16x16xf32> to vector<16xf32>
    %95 = vector.shape_cast %94 : vector<16xf32> to vector<16x1xf32>
    %96 = tpu.reciprocal %95 {approx = true} : vector<16x1xf32> -> vector<16x1xf32>
    %97 = vector.broadcast %96 : vector<16x1xf32> to vector<16x16xf32>
    %98 = arith.mulf %93, %97 : vector<16x16xf32>
    %99 = arith.truncf %98 : vector<16x16xf32> to vector<16x16xbf16>
    %cst_49 = arith.constant dense<0.000000e+00> : vector<16x16xf32>
    %100 = tpu.matmul %99, %87, %cst_49 {dimension_numbers = #tpu.dot_dimension_numbers<[1], [0], [0], [1], [0, 0, 1, 1], [], []>} : vector<16x16xbf16>, vector<16x16xbf16>, vector<16x16xf32> -> vector<16x16xf32>
    %101 = arith.truncf %100 : vector<16x16xf32> to vector<16x16xbf16>
    %c0_50 = arith.constant 0 : index
    %c48_51 = arith.constant 48 : index
    %102 = vector.load %arg15[%c0_50, %c48_51] : memref<16x64xbf16, #tpu.memory_space<vmem>>, vector<16x16xbf16>
    tpu.vector_store %arg15[%c0_50, %c48_51], %101 {strides = array<i32>} : memref<16x64xbf16, #tpu.memory_space<vmem>>, vector<16x16xbf16>,
    %c0_52 = arith.constant 0 : index
    %c0_53 = arith.constant 0 : index
    %103 = vector.load %arg15[%c0_52, %c0_53] : memref<16x64xbf16, #tpu.memory_space<vmem>>, vector<16x64xbf16>
    %c0_54 = arith.constant 0 : index
    %c0_55 = arith.constant 0 : index
    %104 = vector.load %arg5[%c0_54, %c0_55] : memref<64x64xbf16, #tpu.memory_space<vmem>>, vector<64x64xbf16>
    %cst_56 = arith.constant dense<0.000000e+00> : vector<16x64xf32>
    %105 = tpu.matmul %103, %104, %cst_56 {dimension_numbers = #tpu.dot_dimension_numbers<[1], [0], [0], [1], [0, 0, 1, 1], [], []>} : vector<16x64xbf16>, vector<64x64xbf16>, vector<16x64xf32> -> vector<16x64xf32>
    %c0_57 = arith.constant 0 : index
    %c0_58 = arith.constant 0 : index
    %106 = vector.load %arg6[%c0_57, %c0_58] : memref<1x64xf32, #tpu.memory_space<vmem>>, vector<1x64xf32>
    %107 = vector.broadcast %106 : vector<1x64xf32> to vector<16x64xf32>
    %108 = arith.addf %105, %107 : vector<16x64xf32>
    %109 = arith.addf %1, %108 : vector<16x64xf32>
    %c0_59 = arith.constant 0 : index
    %c0_60 = arith.constant 0 : index
    %110 = vector.load %arg7[%c0_59, %c0_60] : memref<1x64xf32, #tpu.memory_space<vmem>>, vector<1x64xf32>
    %c0_61 = arith.constant 0 : index
    %c0_62 = arith.constant 0 : index
    %111 = vector.load %arg8[%c0_61, %c0_62] : memref<1x64xf32, #tpu.memory_space<vmem>>, vector<1x64xf32>
    %cst_63 = arith.constant dense<0.000000e+00> : vector<16xf32>
    %112 = vector.multi_reduction <add>, %109, %cst_63 [1] : vector<16x64xf32> to vector<16xf32>
    %113 = vector.shape_cast %112 : vector<16xf32> to vector<16x1xf32>
    %cst_64 = arith.constant 6.400000e+01 : f32
    %114 = vector.broadcast %cst_64 : f32 to vector<16x1xf32>
    %115 = arith.divf %113, %114 : vector<16x1xf32>
    %116 = vector.broadcast %115 : vector<16x1xf32> to vector<16x64xf32>
    %117 = arith.subf %109, %116 : vector<16x64xf32>
    %118 = arith.mulf %117, %117 : vector<16x64xf32>
    %cst_65 = arith.constant dense<0.000000e+00> : vector<16xf32>
    %119 = vector.multi_reduction <add>, %118, %cst_65 [1] : vector<16x64xf32> to vector<16xf32>
    %120 = vector.shape_cast %119 : vector<16xf32> to vector<16x1xf32>
    %cst_66 = arith.constant 6.400000e+01 : f32
    %121 = vector.broadcast %cst_66 : f32 to vector<16x1xf32>
    %122 = arith.divf %120, %121 : vector<16x1xf32>
    %123 = vector.broadcast %115 : vector<16x1xf32> to vector<16x64xf32>
    %124 = arith.subf %109, %123 : vector<16x64xf32>
    %cst_67 = arith.constant 9.99999974E-6 : f32
    %125 = vector.broadcast %cst_67 : f32 to vector<16x1xf32>
    %126 = arith.addf %122, %125 : vector<16x1xf32>
    %127 = math.rsqrt %126 : vector<16x1xf32>
    %128 = vector.broadcast %127 : vector<16x1xf32> to vector<16x64xf32>
    %129 = arith.mulf %124, %128 : vector<16x64xf32>
    %130 = vector.broadcast %110 : vector<1x64xf32> to vector<16x64xf32>
    %131 = arith.mulf %129, %130 : vector<16x64xf32>
    %132 = vector.broadcast %111 : vector<1x64xf32> to vector<16x64xf32>
    %133 = arith.addf %131, %132 : vector<16x64xf32>
    %134 = arith.truncf %133 : vector<16x64xf32> to vector<16x64xbf16>
    %c0_68 = arith.constant 0 : index
    %c0_69 = arith.constant 0 : index
    %135 = vector.load %arg9[%c0_68, %c0_69] : memref<64x256xbf16, #tpu.memory_space<vmem>>, vector<64x256xbf16>
    %cst_70 = arith.constant dense<0.000000e+00> : vector<16x256xf32>
    %136 = tpu.matmul %134, %135, %cst_70 {dimension_numbers = #tpu.dot_dimension_numbers<[1], [0], [0], [1], [0, 0, 1, 1], [], []>} : vector<16x64xbf16>, vector<64x256xbf16>, vector<16x256xf32> -> vector<16x256xf32>
    %c0_71 = arith.constant 0 : index
    %c0_72 = arith.constant 0 : index
    %137 = vector.load %arg10[%c0_71, %c0_72] : memref<1x256xf32, #tpu.memory_space<vmem>>, vector<1x256xf32>
    %138 = vector.broadcast %137 : vector<1x256xf32> to vector<16x256xf32>
    %139 = arith.addf %136, %138 : vector<16x256xf32>
    %cst_73 = arith.constant 5.000000e-01 : f32
    %140 = vector.broadcast %cst_73 : f32 to vector<16x256xf32>
    %141 = arith.mulf %139, %140 : vector<16x256xf32>
    %cst_74 = arith.constant 1.41421354 : f32
    %142 = vector.broadcast %cst_74 : f32 to vector<16x256xf32>
    %143 = arith.divf %139, %142 : vector<16x256xf32>
    %144 = math.erf %143 : vector<16x256xf32>
    %cst_75 = arith.constant 1.000000e+00 : f32
    %145 = vector.broadcast %cst_75 : f32 to vector<16x256xf32>
    %146 = arith.addf %145, %144 : vector<16x256xf32>
    %147 = arith.mulf %141, %146 : vector<16x256xf32>
    %148 = arith.truncf %147 : vector<16x256xf32> to vector<16x256xbf16>
    %c0_76 = arith.constant 0 : index
    %c0_77 = arith.constant 0 : index
    %149 = vector.load %arg11[%c0_76, %c0_77] : memref<256x64xbf16, #tpu.memory_space<vmem>>, vector<256x64xbf16>
    %cst_78 = arith.constant dense<0.000000e+00> : vector<16x64xf32>
    %150 = tpu.matmul %148, %149, %cst_78 {dimension_numbers = #tpu.dot_dimension_numbers<[1], [0], [0], [1], [0, 0, 1, 1], [], []>} : vector<16x256xbf16>, vector<256x64xbf16>, vector<16x64xf32> -> vector<16x64xf32>
    %c0_79 = arith.constant 0 : index
    %c0_80 = arith.constant 0 : index
    %151 = vector.load %arg12[%c0_79, %c0_80] : memref<1x64xf32, #tpu.memory_space<vmem>>, vector<1x64xf32>
    %152 = vector.broadcast %151 : vector<1x64xf32> to vector<16x64xf32>
    %153 = arith.addf %150, %152 : vector<16x64xf32>
    %154 = arith.addf %109, %153 : vector<16x64xf32>
    %155 = vector.shape_cast %154 : vector<16x64xf32> to vector<1x16x64xf32>
    %c0_81 = arith.constant 0 : index
    %c0_82 = arith.constant 0 : index
    %c0_83 = arith.constant 0 : index
    %156 = vector.load %arg13[%c0_81, %c0_82, %c0_83] : memref<1x16x64xf32, #tpu.memory_space<vmem>>, vector<1x16x64xf32>
    tpu.vector_store %arg13[%c0_81, %c0_82, %c0_83], %155 {strides = array<i32>} : memref<1x16x64xf32, #tpu.memory_space<vmem>>, vector<1x16x64xf32>,
    return
  }
  func.func @transform_0(%arg0: i32) -> (i32, i32, i32) {
    %c0_i32 = arith.constant 0 : i32
    %c0_i32_0 = arith.constant 0 : i32
    %c0_i32_1 = arith.constant 0 : i32
    return %arg0, %c0_i32, %c0_i32_0 : i32, i32, i32
  }
  func.func @transform_1(%arg0: i32) -> (i32, i32) {
    %c0_i32 = arith.constant 0 : i32
    %c0_i32_0 = arith.constant 0 : i32
    %c0_i32_1 = arith.constant 0 : i32
    return %c0_i32, %c0_i32_0 : i32, i32
  }
  func.func @transform_2(%arg0: i32) -> (i32, i32) {
    %c0_i32 = arith.constant 0 : i32
    %c0_i32_0 = arith.constant 0 : i32
    %c0_i32_1 = arith.constant 0 : i32
    return %c0_i32, %c0_i32_0 : i32, i32
  }
  func.func @transform_3(%arg0: i32) -> (i32, i32) {
    %c0_i32 = arith.constant 0 : i32
    %c0_i32_0 = arith.constant 0 : i32
    %c0_i32_1 = arith.constant 0 : i32
    return %c0_i32, %c0_i32_0 : i32, i32
  }
  func.func @transform_4(%arg0: i32) -> (i32, i32) {
    %c0_i32 = arith.constant 0 : i32
    %c0_i32_0 = arith.constant 0 : i32
    %c0_i32_1 = arith.constant 0 : i32
    return %c0_i32, %c0_i32_0 : i32, i32
  }
  func.func @transform_5(%arg0: i32) -> (i32, i32) {
    %c0_i32 = arith.constant 0 : i32
    %c0_i32_0 = arith.constant 0 : i32
    %c0_i32_1 = arith.constant 0 : i32
    return %c0_i32, %c0_i32_0 : i32, i32
  }
  func.func @transform_6(%arg0: i32) -> (i32, i32) {
    %c0_i32 = arith.constant 0 : i32
    %c0_i32_0 = arith.constant 0 : i32
    %c0_i32_1 = arith.constant 0 : i32
    return %c0_i32, %c0_i32_0 : i32, i32
  }
  func.func @transform_7(%arg0: i32) -> (i32, i32) {
    %c0_i32 = arith.constant 0 : i32
    %c0_i32_0 = arith.constant 0 : i32
    %c0_i32_1 = arith.constant 0 : i32
    return %c0_i32, %c0_i32_0 : i32, i32
  }
  func.func @transform_8(%arg0: i32) -> (i32, i32) {
    %c0_i32 = arith.constant 0 : i32
    %c0_i32_0 = arith.constant 0 : i32
    %c0_i32_1 = arith.constant 0 : i32
    return %c0_i32, %c0_i32_0 : i32, i32
  }
  func.func @transform_9(%arg0: i32) -> (i32, i32) {
    %c0_i32 = arith.constant 0 : i32
    %c0_i32_0 = arith.constant 0 : i32
    %c0_i32_1 = arith.constant 0 : i32
    return %c0_i32, %c0_i32_0 : i32, i32
  }
  func.func @transform_10(%arg0: i32) -> (i32, i32) {
    %c0_i32 = arith.constant 0 : i32
    %c0_i32_0 = arith.constant 0 : i32
    %c0_i32_1 = arith.constant 0 : i32
    return %c0_i32, %c0_i32_0 : i32, i32
  }
  func.func @transform_11(%arg0: i32) -> (i32, i32) {
    %c0_i32 = arith.constant 0 : i32
    %c0_i32_0 = arith.constant 0 : i32
    %c0_i32_1 = arith.constant 0 : i32
    return %c0_i32, %c0_i32_0 : i32, i32
  }
  func.func @transform_12(%arg0: i32) -> (i32, i32, i32) {
    %c0_i32 = arith.constant 0 : i32
    %c0_i32_0 = arith.constant 0 : i32
    %c0_i32_1 = arith.constant 0 : i32
    return %arg0, %c0_i32, %c0_i32_0 : i32, i32, i32
  }
}

</mosaic_0001>

<bundles_post_ra>
// kernel: tpu_custom_call.1
= control target key start
LH: loop header
LB: loop body
LE: loop exit
PB: predicated region body
PF: predicated region fallthrough
CT: control target
= control target key end

     0   :  { %s2622_s0 = inlined_call_operand.vmem [shape: f32[2,16,64], index: 0, kind: input, shape index: {}]   ;;  %s2623_s1 = inlined_call_operand.hbm [shape: f32[1,64], index: 1, kind: input, shape index: {}]   ;;  %s2624_s2 = inlined_call_operand.vmem [shape: f32[1,64], index: 2, kind: input, shape index: {}]   ;;  %s2625_s3 = inlined_call_operand.vmem [shape: bf16[64,192], index: 3, kind: input, shape index: {}]   ;;  %s2626_s4 = inlined_call_operand.vmem [shape: bf16[64,64], index: 4, kind: input, shape index: {}]   ;;  %s2627_s5 = inlined_call_operand.vmem [shape: f32[1,64], index: 5, kind: input, shape index: {}]   ;;  %s2628_s6 = inlined_call_operand.vmem [shape: f32[1,64], index: 6, kind: input, shape index: {}]   ;;  %s2629_s7 = inlined_call_operand.vmem [shape: f32[1,64], index: 7, kind: input, shape index: {}]   ;;  %s2630_s8 = inlined_call_operand.vmem [shape: bf16[64,256], index: 8, kind: input, shape index: {}]   ;;  %s2631_s9 = inlined_call_operand.vmem [shape: f32[1,256], index: 9, kind: input, shape index: {}]   ;;  %s2632_s10 = inlined_call_operand.vmem [shape: bf16[256,64], index: 10, kind: input, shape index: {}]   ;;  %s2633_s11 = inlined_call_operand.vmem [shape: f32[1,64], index: 11, kind: input, shape index: {}]   ;;  %s2634_s12 = inlined_call_operand.hbm [shape: f32[2,16,64], index: 12, kind: output, shape index: {}]  }
   0x1   :  { %2635 = sst [smem:[#allocation10_spill]] %s2622_s0 }
   0x2   :  { %2636 = sst [smem:[#allocation11_spill]] %s2623_s1 }
   0x3   :  { %17 = vsyncpa [#allocation5], 0 }
   0x4   :  { %18 = vsyncpa [#allocation6], 0 }
   0x5   :  { %20 = vsyncpa [#allocation6 + $0x1], 0  ;;  %s2248_s21 = smov 0   ;;  %s2250_s22 = smov 0  }
   0x6   :  { %s2252_s23 = smov 0   ;;  %s2254_s24 = smov 0  }
   0x7 LB: > { %s2269_s25 = sadd.s32 4294967295, %s2167_s24   ;;  %s1713_s26 = sadd.s32 4294967294, %s2167_s24   ;;  %s2167_s24 = sphi %s2254_s24, %s2645_s24   ;;  %s2163_s23 = sphi %s2252_s23, %s2644_s23   ;;  %s2159_s22 = sphi %s2250_s22, %s2643_s22   ;;  %s2155_s21 = sphi %s2248_s21, %s2642_s21  }
   0x8   : > { %s2273_s27 = sadd.s32 1, %s2167_s24   ;;  %s290_s28 = sadd.s32 1, %s2163_s23 }
   0x9   : > { %s287_s29 = ssub.s32 %s2167_s24, %s2273_s27  ;;  %p300_p0 = scmp.ne.s32.totalorder %s2163_s23, %s2159_s22 }
   0xa   : > { %p288_p1 = scmp.eq.s32.totalorder %s287_s29, 0  ;;  %p301_p2 = scmp.eq.s32.totalorder %s2269_s25, 1 }
   0xb   : > { %p306_p3 = scmp.ne.s32.totalorder %s2159_s22, %s2155_s21  ;;  %p307_p4 = scmp.eq.s32.totalorder %s1713_s26, 1 }
   0xc   : > { %s2284_s30 = scalar_select %p288_p1, %s2163_s23, %s290_s28  }
   0xd   : > { %p2286_p5 = por %p301_p2, %p300_p0  ;;  %p2290_p6 = por %p307_p4, %p306_p3 }
   0xe   : > { %p1714_p7 = scmp.ge.s32.totalorder %s2167_s24, 1  ;;  %p314_p8 = scmp.lt.s32.totalorder %s2167_s24, 3 }
   0xf   : > { %p1928_p9 = scmp.eq.s32.totalorder %s2269_s25, 0  ;;  %s2169_s16 = smov [#allocation4]  }
  0x10   : > { %p2297_p10 = pnand %p1714_p7, %p314_p8  ;;  %s327_s17 = sshll.u32 %s2169_s16, 4  ;;  %s328_s17 = int_to_ptr.vmem [resolvable:$true] %s327_s17 }
  0x11   : > { %s2088_s18 = scalar_lea.vmem %s328_s17, 16  ;;  %s2095_s19 = scalar_lea.vmem %s328_s17, 32 }
  0x12   : > { %p1920_p11 = pneg %p2297_p10  ;;  %p2089_p0 = scmp.ne.s32.totalorder %s328_s17, %s2088_s18 }
  0x13   : > { %p2096_p3 = scmp.lt.s32.totalorder %s328_s17, %s328_s17  ;;  %p2097_p4 = scmp.lt.s32.totalorder %s2095_s19, %s2088_s18 }
  0x14   : > { %p1921_p12 = pnand %p1928_p9, %p1920_p11 }
  0x15   : > { %p2098_p7 = por %p2097_p4, %p2096_p3 }
  0x16   : > { %p2079_p13 = pneg %p1921_p12 }
  0x18   : > { %p2091_p1 = pnand %p2089_p0, %p2079_p13 }
  0x1a   : > { %p2092_p2 = pneg %p2091_p1 }
  0x1c   : > { %p2099_p8 = pnand %p2098_p7, %p2092_p2 }
  0x1e   : > { %2102 = shalt.err (!%p2099_p8)
}
  0x1f   : > { %s2640_s1 = sld [smem:[#allocation11_spill]] }
  0x21   : > { %378 = sbr.rel (%p2297_p10) target bundleno = 2546 (0x9f2), region = 68 }
  0x25   : > { %1923 = dma.hbm_to_vmem [thread:$0]  (!%p1921_p12), %s2640_s1, 16, %s328_s17, [#allocation5]  }
  0x26   : > { %2146 = dma.done.wait (%p1928_p9), [#allocation5], 16  }
  0x27   : > { %2148 = vsyncadd (%p1928_p9), [#allocation5], 4294967280  ;;  %p420_p11 = scmp.lt.s32.totalorder %s2269_s25, 1  ;;  %s2641_s0 = sld [smem:[#allocation10_spill]]  ;;  %vm430_vm0 = vcmask 523264   ;;  %v2170_v18 = vmov 0  }
  0x28   : > { %v1976_v14 = vld [vmem:[%s2625_s3 + $0x34] ss:$8 sps:$4 sm:$0xff]   ;;  %v1978_v15 = vld [vmem:[%s2625_s3 + $0x30] ss:$8 sps:$4 sm:$0xff]   ;;  %v1979_v16 = vld [vmem:[%s2625_s3 + $0x24] ss:$8 sps:$4 sm:$0xff]   ;;  %558 = vmatprep.mubr.bf16.mxu1 %v2170_v18 }
  0x29   : > { %s421_s28 = scalar_select %p420_p11, %s2269_s25, 1  ;;  %534 = vmatprep.subr.bf16.mxu1 %v1976_v14  ;;  %v1981_v17 = vld [vmem:[%s2625_s3 + $0x20] ss:$8 sps:$4 sm:$0xff]   ;;  %v1982_v19 = vld [vmem:[%s2625_s3 + $0x14] ss:$8 sps:$4 sm:$0xff]   ;;  %vm581_vm1 = vcmask 1043456  }
  0x2a   : > { %535 = vmatpush1.bf16.msra.mxu1 %v1978_v15  ;;  %v1984_v20 = vld [vmem:[%s2625_s3 + $0x10] ss:$8 sps:$4 sm:$0xff]   ;;  %v1985_v21 = vld [vmem:[%s2625_s3 + $0x4] ss:$8 sps:$4 sm:$0xff]   ;;  %v1987_v22 = vld [vmem:[%s2625_s3] ss:$8 sps:$4 sm:$0xff]  }
  0x2b   : > { %s1799_s29 = sshll.u32 %s421_s28, 4  ;;  %536 = vmatprep.subr.bf16.mxu1 %v1979_v16  ;;  %v1722_v31 = vld [vmem:[#allocation4] ss:$0 sm:$0xff]  ;;  %v1723_v35 = vld [vmem:[%s2624_s2] ss:$0 sm:$0xff]  ;;  %vm582_vm2 = vcmask 523268  }
  0x2c   : > { %vm583_vm3 = vmor %vm582_vm2, %vm581_vm1  ;;  %v2171_v46 = vmov 0.0   ;;  %vm2172_vm4 = vmmov 0   ;;  %s2173_s15 = smov 48   ;;  %s2174_s17 = smov 64   ;;  %vm597_vm5 = vcmask 130048   ;;  %vm726_vm6 = vcmask 125952  }
  0x2d   : > { %s424_s19 = scalar_lea.vmem %s2641_s0, %s1799_s29  ;;  %1866 = vmatprep.subr.bf16.mxu0 %v2171_v46  ;;  %1868 = vmatprep.mubr.msk.bf16.mxu0 %vm2172_vm4, %v2171_v46  ;;  %s2175_s20 = smov 112   ;;  %vm876_vm7 = vcmask 257152   ;;  %vm1026_vm8 = vcmask 388352   ;;  %vm1176_vm9 = vcmask 519552  }
  0x2e   : > { %v2319_v0 = vld [vmem:[%s424_s19] sm:$0xff]  ;;  %v2321_v1 = vld [vmem:[%s424_s19 + $0x8] sm:$0xff]  ;;  %537 = vmatpush1.bf16.msra.mxu1 %v1981_v17  ;;  %s2176_s26 = smov 96   ;;  %s2177_s28 = smov 32  }
  0x2f   : > { %v431_v2 = vsel %vm430_vm0, %v2319_v0, 0.0  ;;  %v434_v3 = vsel %vm430_vm0, %v2321_v1, 0.0  ;;  %538 = vmatprep.subr.bf16.mxu1 %v1982_v19  ;;  %s2178_s29 = smov 80   ;;  %s2179_s16 = smov 16  }
  0x30   : > { %432 = vadd.xlane.f32.xlu0 %v431_v2  ;;  %s2180_s0 = smov [#allocation7]  }
  0x32   : > { %539 = vmatpush1.bf16.msra.mxu1 %v1984_v20 }
  0x33   : > { %540 = vmatprep.subr.bf16.mxu1 %v1985_v21 }
  0x34   : > { %435 = vadd.xlane.f32.xlu0 %v434_v3 }
  0x36   : > { %541 = vmatpush1.bf16.msra.mxu1 %v1987_v22 }
  0x37   : > { %1854 = vmatprep.subr.bf16.mxu1 %v2171_v46 }
  0xb9   : > { %v433_v4 = vpop.xlane.xlu0 %432 }
  0xba   : > { %v438_v5 = vmul.f32 0.015625, %v433_v4 }
  0xbc   : > { %v440_v6 = vsub.f32 %v2319_v0, %v438_v5 }
  0xbd   : > { %v436_v7 = vpop.xlane.xlu0 %435 }
  0xbe   : > { %v439_v8 = vmul.f32 0.015625, %v436_v7  ;;  %v442_v9 = vmul.f32 %v440_v6, %v440_v6 }
  0xc0   : > { %v441_v10 = vsub.f32 %v2321_v1, %v439_v8  ;;  %v444_v11 = vsel %vm430_vm0, %v442_v9, 0.0 }
  0xc1   : > { %445 = vadd.xlane.f32.xlu1 %v444_v11 }
  0xc2   : > { %v443_v12 = vmul.f32 %v441_v10, %v441_v10 }
  0xc4   : > { %v447_v13 = vsel %vm430_vm0, %v443_v12, 0.0 }
  0xc5   : > { %448 = vadd.xlane.f32.xlu1 %v447_v13 }
 0x14a   : > { %v446_v23 = vpop.xlane.xlu1 %445 }
 0x14b   : > { %v450_v24 = vmul.f32 0.015625, %v446_v23 }
 0x14d   : > { %v452_v25 = vadd.f32 1e-05, %v450_v24 }
 0x14e   : > { %v449_v26 = vpop.xlane.xlu1 %448 }
 0x14f   : > { %2029 = vrsqrt.f32 %v452_v25  ;;  %v451_v27 = vmul.f32 0.015625, %v449_v26 }
 0x151   : > { %v453_v28 = vadd.f32 1e-05, %v451_v27 }
 0x153   : > { %2031 = vrsqrt.f32 %v453_v28 }
 0x15c   : > { %v2030_v29 = vpop.eup %2029 }
 0x15d   : > { %v456_v30 = vmul.f32 %v2030_v29, %v440_v6 }
 0x15f   : > { %v464_v34 = vmul.f32 %v1722_v31, %v456_v30 }
 0x160   : > { %v2032_v32 = vpop.eup %2031 }
 0x161   : > { %v457_v33 = vmul.f32 %v2032_v32, %v441_v10  ;;  %v472_v37 = vadd.f32 %v1723_v35, %v464_v34 }
 0x163   : > { %v465_v36 = vmul.f32 %v1722_v31, %v457_v33 }
 0x165   : > { %v473_v38 = vadd.f32 %v1723_v35, %v465_v36 }
 0x167   : > { %v474_v39 = vpack.c.bf16 %v473_v38, %v472_v37 }
 0x169   : > { %1732 = vmatmul.mubr.msk.bf16.vlgmr.msra.gmra.mxu1 %vm430_vm0, %v474_v39 }
 0x16a   : > { %1856 = vmatprep.mubr.msk.bf16.mxu1 %vm2172_vm4, %v2171_v46 }
 0x229   : > { %v560_v40 = vpop.f32.mrf.mxu1 }
 0x22b   : > { %v562_v41 = vpop.f32.mrf.mxu1 }
 0x22c   : > { %v1800_v42 = vpack.c.bf16 %v562_v41, %v560_v40 }
 0x22d   : > { %v564_v43 = vpop.f32.mrf.mxu1 }
 0x22e   : > { %584 = vst.msk [vmem:[#allocation2] sm:$0xff] %vm583_vm3, %v1800_v42 }
 0x22f   : > { %v566_v44 = vpop.f32.mrf.mxu1 }
 0x230   : > { %v1801_v45 = vpack.c.bf16 %v566_v44, %v564_v43 }
 0x232   : > { %585 = vst.msk [vmem:[#allocation2 + $0x8] sm:$0xff] %vm583_vm3, %v1801_v45 }
 0x239   : > { %v1988_v47 = vld [vmem:[#allocation2] ss:$8 sps:$4 sm:$0xff]   ;;  %v1992_v58 = vld [vmem:[#allocation2 + $0x4] ss:$8 sps:$4 sm:$0xff]  }
 0x23a   : > { %v1989_v48 = vld [vmem:[#allocation2] ss:$8 sps:$4 sm:$0xff]   ;;  %740 = vrot.lane.b32.xlu1 %v1988_v47, %s2173_s15 }
 0x23b   : > { %595 = vrot.lane.b32.xlu0 %v1989_v48, %s2174_s17  ;;  %v1990_v49 = vld [vmem:[#allocation2] ss:$8 sps:$4 sm:$0xff]  }
 0x23c   : > { %v1991_v50 = vld [vmem:[#allocation2] ss:$8 sps:$4 sm:$0xff]  }
 0x23e   : > { %738 = vrot.lane.b32.xlu1 %v1988_v47, %s2175_s20 }
 0x23f   : > { %888 = vrot.lane.b32.xlu0 %v1990_v49, %s2176_s26 }
 0x242   : > { %890 = vrot.lane.b32.xlu1 %v1990_v49, %s2177_s28 }
 0x243   : > { %1038 = vrot.lane.b32.xlu0 %v1991_v50, %s2178_s29 }
 0x246   : > { %1040 = vrot.lane.b32.xlu1 %v1991_v50, %s2179_s16 }
 0x2ac   : > { %v741_v51 = vpop.permute.xlu1 %740 }
 0x2ad   : > { %v596_v52 = vpop.permute.xlu0 %595  ;;  %v746_v53 = vsel %vm597_vm5, %v741_v51, 0  ;;  %v1993_v51 = vld [vmem:[#allocation2 + $0x4] ss:$8 sps:$4 sm:$0xff]  }
 0x2ae   : > { %v602_v54 = vsel %vm597_vm5, %v596_v52, 0  ;;  %1867 = vmatpush3.bf16.xpose.msra.mxu0 %v746_v53 }
 0x2af   : > { %1855 = vmatpush3.bf16.xpose.msra.mxu1 %v602_v54  ;;  %1878 = vmatprep.subr.bf16.mxu0 %v2171_v46 }
 0x2b0   : > { %v739_v55 = vpop.permute.xlu1 %738  ;;  %1860 = vmatprep.subr.bf16.mxu1 %v2171_v46 }
 0x2b1   : > { %v889_v60 = vpop.permute.xlu0 %888 }
 0x2b4   : > { %v891_v56 = vpop.permute.xlu1 %890 }
 0x2b5   : > { %v896_v57 = vsel %vm597_vm5, %v891_v56, 0  ;;  %1869 = vmatmul.mubr.msk.bf16.vlgmr.msra.gmra.mxu0 %vm597_vm5, %v739_v55  ;;  %v1039_v62 = vpop.permute.xlu0 %1038 }
 0x2b6   : > { %1857 = vmatmul.mubr.msk.bf16.vlgmr.msra.gmra.mxu1 %vm597_vm5, %v1989_v48  ;;  %1879 = vmatpush3.bf16.xpose.msra.mxu0 %v896_v57 }
 0x2b7   : > { %1861 = vmatpush3.bf16.msra.mxu1 %v1992_v58  ;;  %1880 = vmatprep.mubr.msk.bf16.mxu0 %vm2172_vm4, %v2171_v46 }
 0x2b8   : > { %1890 = vmatprep.subr.bf16.mxu0 %v2171_v46  ;;  %1862 = vmatprep.mubr.msk.bf16.mxu1 %vm2172_vm4, %v2171_v46  ;;  %v1041_v59 = vpop.permute.xlu1 %1040 }
 0x2b9   : > { %1872 = vmatprep.subr.bf16.mxu1 %v2171_v46  ;;  %v1046_v61 = vsel %vm597_vm5, %v1041_v59, 0 }
 0x2bd   : > { %1881 = vmatmul.mubr.msk.bf16.vlgmr.msra.gmra.mxu0 %vm597_vm5, %v889_v60 }
 0x2be   : > { %1891 = vmatpush3.bf16.xpose.msra.mxu0 %v1046_v61  ;;  %1892 = vmatprep.mubr.msk.bf16.mxu0 %vm2172_vm4, %v2171_v46 }
 0x2bf   : > { %1902 = vmatprep.subr.bf16.mxu0 %v2171_v46 }
 0x2c5   : > { %1893 = vmatmul.mubr.msk.bf16.vlgmr.msra.gmra.mxu0 %vm597_vm5, %v1039_v62  ;;  %v1994_v62 = vld [vmem:[#allocation2 + $0x4] ss:$8 sps:$4 sm:$0xff]  }
 0x2c6   : > { %1910 = vmatprep.mubr.msk.bf16.mxu0 %vm2172_vm4, %v2171_v46 }
 0x375   : > { %v2393_v63 = vpop.f32.mrf.mxu0 }
 0x376   : > { %v638_v2 = vpop.f32.mrf.mxu1  ;;  %v789_v13 = vsel %vm597_vm5, %v2393_v63, -inf }
 0x377   : > { %v1870_v3 = vpop.f32.mrf.mxu0  ;;  %v645_v4 = vsel %vm597_vm5, %v638_v2, -inf }
 0x378   : > { %646 = vmax.xlane.f32.xlu1 %v645_v4  ;;  %v1858_v5 = vpop.f32.mrf.mxu1 }
 0x379   : > { %v785_v6 = vpop.f32.mrf.mxu0 }
 0x37a   : > { %v641_v7 = vpop.f32.mrf.mxu1  ;;  %v792_v16 = vsel %vm597_vm5, %v785_v6, -inf }
 0x37b   : > { %v1871_v8 = vpop.f32.mrf.mxu0  ;;  %v648_v9 = vsel %vm597_vm5, %v641_v7, -inf }
 0x37c   : > { %649 = vmax.xlane.f32.xlu0 %v648_v9  ;;  %v1859_v10 = vpop.f32.mrf.mxu1 }
 0x37d   : > { %v2397_v11 = vpop.f32.mrf.mxu0 }
 0x37e   : > { %v939_v12 = vsel %vm597_vm5, %v2397_v11, -inf }
 0x37f   : > { %940 = vmax.xlane.f32.xlu1 %v939_v12  ;;  %v1882_v14 = vpop.f32.mrf.mxu0 }
 0x380   : > { %790 = vmax.xlane.f32.xlu0 %v789_v13 }
 0x381   : > { %v935_v15 = vpop.f32.mrf.mxu0 }
 0x382   : > { %v942_v21 = vsel %vm597_vm5, %v935_v15, -inf }
 0x383   : > { %v1883_v17 = vpop.f32.mrf.mxu0 }
 0x384   : > { %793 = vmax.xlane.f32.xlu0 %v792_v16 }
 0x385   : > { %v1082_v19 = vpop.f32.mrf.mxu0 }
 0x386   : > { %v1089_v20 = vsel %vm597_vm5, %v1082_v19, -inf }
 0x387   : > { %1090 = vmax.xlane.f32.xlu1 %v1089_v20  ;;  %v1894_v22 = vpop.f32.mrf.mxu0 }
 0x388   : > { %943 = vmax.xlane.f32.xlu0 %v942_v21 }
 0x389   : > { %v1085_v23 = vpop.f32.mrf.mxu0 }
 0x38a   : > { %v1092_v24 = vsel %vm597_vm5, %v1085_v23, -inf }
 0x38b   : > { %v1895_v25 = vpop.f32.mrf.mxu0 }
 0x38c   : > { %1093 = vmax.xlane.f32.xlu0 %v1092_v24 }
 0x401   : > { %v647_v26 = vpop.xlane.xlu1 %646 }
 0x402   : > { %v651_v27 = vsub.f32 %v638_v2, %v647_v26 }
 0x404   : > { %v653_v28 = vmul.f32 1.442695, %v651_v27 }
 0x405   : > { %v650_v29 = vpop.xlane.xlu0 %649 }
 0x406   : > { %2033 = vpow2.f32 %v653_v28  ;;  %v652_v30 = vsub.f32 %v641_v7, %v650_v29  ;;  %v1995_v7 = vld [vmem:[#allocation2 + $0x4] ss:$8 sps:$4 sm:$0xff]  }
 0x408   : > { %v655_v31 = vmul.f32 1.442695, %v652_v30  ;;  %v941_v55 = vpop.xlane.xlu1 %940 }
 0x409   : > { %v791_v32 = vpop.xlane.xlu0 %790  ;;  %v945_v56 = vsub.f32 %v2397_v11, %v941_v55 }
 0x40a   : > { %2035 = vpow2.f32 %v655_v31  ;;  %v795_v54 = vsub.f32 %v2393_v63, %v791_v32 }
 0x40b   : > { %v947_v59 = vmul.f32 1.442695, %v945_v56 }
 0x40c   : > { %v797_v57 = vmul.f32 1.442695, %v795_v54 }
 0x40d   : > { %v794_v33 = vpop.xlane.xlu0 %793 }
 0x40e   : > { %v796_v34 = vsub.f32 %v785_v6, %v794_v33 }
 0x410   : > { %v799_v35 = vmul.f32 1.442695, %v796_v34  ;;  %v1091_v58 = vpop.xlane.xlu1 %1090 }
 0x411   : > { %v944_v36 = vpop.xlane.xlu0 %943  ;;  %v1095_v60 = vsub.f32 %v1082_v19, %v1091_v58 }
 0x412   : > { %2037 = vpow2.f32 %v799_v35  ;;  %v946_v37 = vsub.f32 %v935_v15, %v944_v36 }
 0x413   : > { %v2034_v38 = vpop.eup %2033  ;;  %v1097_v61 = vmul.f32 1.442695, %v1095_v60 }
 0x414   : > { %v949_v39 = vmul.f32 1.442695, %v946_v37  ;;  %v657_v40 = vsel %vm597_vm5, %v2034_v38, 0.0 }
 0x415   : > { %658 = vadd.xlane.f32.xlu1 %v657_v40  ;;  %v1094_v41 = vpop.xlane.xlu0 %1093 }
 0x416   : > { %2039 = vpow2.f32 %v949_v39  ;;  %v1096_v42 = vsub.f32 %v1085_v23, %v1094_v41 }
 0x417   : > { %v2036_v43 = vpop.eup %2035 }
 0x418   : > { %v1099_v44 = vmul.f32 1.442695, %v1096_v42  ;;  %v660_v45 = vsel %vm597_vm5, %v2036_v43, 0.0 }
 0x419   : > { %661 = vadd.xlane.f32.xlu0 %v660_v45 }
 0x41a   : > { %2041 = vpow2.f32 %v1099_v44 }
 0x41b   : > { %2043 = vpow2.f32 %v797_v57  ;;  %v1998_v57 = vld [vmem:[%s2626_s4 + $0x8] sm:$0xff]  }
 0x41c   : > { %2045 = vpow2.f32 %v947_v59  ;;  %v1999_v59 = vld [vmem:[%s2626_s4] sm:$0xff]  }
 0x41d   : > { %2047 = vpow2.f32 %v1097_v61 }
 0x41f   : > { %v2409_v47 = vpop.eup %2037 }
 0x420   : > { %v804_v48 = vsel %vm597_vm5, %v2409_v47, 0.0 }
 0x421   : > { %805 = vadd.xlane.f32.xlu0 %v804_v48 }
 0x423   : > { %v2413_v49 = vpop.eup %2039 }
 0x424   : > { %v954_v50 = vsel %vm597_vm5, %v2413_v49, 0.0 }
 0x425   : > { %955 = vadd.xlane.f32.xlu0 %v954_v50  ;;  %v1996_v50 = vld [vmem:[%s2626_s4 + $0x18] sm:$0xff]  }
 0x426   : > { %817 = vrot.lane.b32.xlu1 %v1993_v51, %s2175_s20  ;;  %1903 = vmatpush3.bf16.msra.mxu0 %v1996_v50 }
 0x427   : > { %v2418_v52 = vpop.eup %2041  ;;  %1904 = vmatprep.subr.bf16.mxu0 %v2171_v46 }
 0x428   : > { %v1104_v53 = vsel %vm597_vm5, %v2418_v52, 0.0  ;;  %v2044_v2 = vpop.eup %2043 }
 0x429   : > { %1105 = vadd.xlane.f32.xlu0 %v1104_v53  ;;  %v801_v3 = vsel %vm597_vm5, %v2044_v2, 0.0  ;;  %v2046_v4 = vpop.eup %2045  ;;  %v1997_v53 = vld [vmem:[%s2626_s4 + $0x10] sm:$0xff]  }
 0x42a   : > { %v951_v63 = vsel %vm597_vm5, %v2046_v4, 0.0  ;;  %v2048_v5 = vpop.eup %2047  ;;  %1905 = vmatpush3.bf16.msra.mxu0 %v1997_v53 }
 0x42b   : > { %v1101_v6 = vsel %vm597_vm5, %v2048_v5, 0.0  ;;  %1906 = vmatprep.subr.bf16.mxu0 %v2171_v46 }
 0x42e   : > { %1907 = vmatpush3.bf16.msra.mxu0 %v1998_v57  ;;  %v2013_v57 = vld [vmem:[%s2632_s10 + $0x78] sm:$0xff]  }
 0x42f   : > { %1908 = vmatprep.subr.bf16.mxu0 %v2171_v46 }
 0x432   : > { %1909 = vmatpush3.bf16.msra.mxu0 %v1999_v59  ;;  %v2015_v59 = vld [vmem:[%s2632_s10 + $0x70] sm:$0xff]  }
 0x433   : > { %1832 = vmatprep.subr.bf16.mxu0 %v2013_v57 }
 0x43f   : > { %967 = vrot.lane.b32.xlu0 %v1994_v62, %s2176_s26 }
 0x44a   : > { %802 = vadd.xlane.f32.xlu1 %v801_v3 }
 0x44e   : > { %952 = vadd.xlane.f32.xlu1 %v951_v63 }
 0x452   : > { %1102 = vadd.xlane.f32.xlu1 %v1101_v6 }
 0x463   : > { %1117 = vrot.lane.b32.xlu1 %v1995_v7, %s2178_s29  ;;  %s417_s29 = sand.u32 1, %s2159_s22  }
 0x464   : > { %s1719_s19 = sshll.u32 %s417_s29, 4 }
 0x49e   : > { %v659_v8 = vpop.xlane.xlu1 %658 }
 0x49f   : > { %2049 = vrcp.f32 %v659_v8 }
 0x4a2   : > { %v662_v9 = vpop.xlane.xlu0 %661  ;;  %v818_v15 = vpop.permute.xlu1 %817 }
 0x4a3   : > { %2051 = vrcp.f32 %v662_v9 }
 0x4aa   : > { %v806_v16 = vpop.xlane.xlu0 %805 }
 0x4ab   : > { %2053 = vrcp.f32 %v806_v16 }
 0x4ac   : > { %v2050_v10 = vpop.eup %2049 }
 0x4ad   : > { %v665_v12 = vmul.f32 %v2050_v10, %v2034_v38 }
 0x4ae   : > { %v956_v19 = vpop.xlane.xlu0 %955 }
 0x4b0   : > { %v2052_v11 = vpop.eup %2051 }
 0x4b1   : > { %v666_v13 = vmul.f32 %v2052_v11, %v2036_v43 }
 0x4b2   : > { %v1106_v23 = vpop.xlane.xlu0 %1105 }
 0x4b3   : > { %v667_v14 = vpack.c.bf16 %v666_v13, %v665_v12  ;;  %v1759_v12 = vld [vmem:[%s2627_s5] ss:$0 sm:$0xff] }
 0x4b5   : > { %1863 = vmatmul.mubr.msk.bf16.vlgmr.msra.gmra.mxu1 %vm597_vm5, %v667_v14 }
 0x4b6   : > { %1873 = vmatpush3.bf16.msra.mxu1 %v818_v15  ;;  %1874 = vmatprep.mubr.msk.bf16.mxu1 %vm2172_vm4, %v2171_v46  ;;  %v968_v29 = vpop.permute.xlu0 %967 }
 0x4b7   : > { %1884 = vmatprep.subr.bf16.mxu1 %v2171_v46 }
 0x4b8   : > { %v2054_v22 = vpop.eup %2053 }
 0x4b9   : > { %v810_v26 = vmul.f32 %v2054_v22, %v2409_v47 }
 0x4d3   : > { %v803_v17 = vpop.xlane.xlu1 %802 }
 0x4d4   : > { %2055 = vrcp.f32 %v803_v17 }
 0x4d7   : > { %v953_v20 = vpop.xlane.xlu1 %952 }
 0x4d8   : > { %2057 = vrcp.f32 %v953_v20 }
 0x4d9   : > { %2059 = vrcp.f32 %v956_v19 }
 0x4db   : > { %v1103_v21 = vpop.xlane.xlu1 %1102 }
 0x4dc   : > { %2061 = vrcp.f32 %v1103_v21 }
 0x4dd   : > { %2063 = vrcp.f32 %v1106_v23 }
 0x4df   : > { %v1118_v35 = vpop.permute.xlu1 %1117 }
 0x4e1   : > { %v2056_v24 = vpop.eup %2055 }
 0x4e2   : > { %v809_v25 = vmul.f32 %v2056_v24, %v2044_v2 }
 0x4e4   : > { %v811_v27 = vpack.c.bf16 %v810_v26, %v809_v25 }
 0x4e5   : > { %v2058_v28 = vpop.eup %2057 }
 0x4e6   : > { %1875 = vmatmul.mubr.msk.bf16.vlgmr.msra.gmra.mxu1 %vm597_vm5, %v811_v27  ;;  %v2060_v30 = vpop.eup %2059  ;;  %v959_v31 = vmul.f32 %v2058_v28, %v2046_v4 }
 0x4e7   : > { %1885 = vmatpush3.bf16.msra.mxu1 %v968_v29  ;;  %1886 = vmatprep.mubr.msk.bf16.mxu1 %vm2172_vm4, %v2171_v46  ;;  %v960_v32 = vmul.f32 %v2060_v30, %v2413_v49 }
 0x4e8   : > { %1896 = vmatprep.subr.bf16.mxu1 %v2171_v46 }
 0x4e9   : > { %v961_v33 = vpack.c.bf16 %v960_v32, %v959_v31  ;;  %v2062_v34 = vpop.eup %2061  ;;  %v2003_v32 = vld [vmem:[%s2630_s8 + $0x34] ss:$8 sps:$4 sm:$0xff]  }
 0x4ea   : > { %v2064_v36 = vpop.eup %2063  ;;  %v1109_v37 = vmul.f32 %v2062_v34, %v2048_v5  ;;  %v2006_v34 = vld [vmem:[%s2630_s8 + $0x24] ss:$8 sps:$4 sm:$0xff]  }
 0x4eb   : > { %v1110_v38 = vmul.f32 %v2064_v36, %v2418_v52  ;;  %v2009_v36 = vld [vmem:[%s2630_s8 + $0x14] ss:$8 sps:$4 sm:$0xff]  }
 0x4ed   : > { %v1111_v39 = vpack.c.bf16 %v1110_v38, %v1109_v37  ;;  %v2007_v37 = vld [vmem:[%s2630_s8 + $0x10] ss:$8 sps:$4 sm:$0xff]   ;;  %v2012_v38 = vld [vmem:[%s2630_s8 + $0x4] ss:$8 sps:$4 sm:$0xff]  }
 0x4ee   : > { %1887 = vmatmul.mubr.msk.bf16.vlgmr.msra.gmra.mxu1 %vm597_vm5, %v961_v33  ;;  %v2001_v33 = vld [vmem:[%s2630_s8 + $0x30] ss:$8 sps:$4 sm:$0xff]  }
 0x4ef   : > { %1897 = vmatpush3.bf16.msra.mxu1 %v1118_v35  ;;  %1898 = vmatprep.mubr.msk.bf16.mxu1 %vm2172_vm4, %v2171_v46  ;;  %v2004_v35 = vld [vmem:[%s2630_s8 + $0x20] ss:$8 sps:$4 sm:$0xff]  }
 0x4f0   : > { %1387 = vmatprep.subr.bf16.mxu1 %v2003_v32 }
 0x4f6   : > { %1899 = vmatmul.mubr.msk.bf16.vlgmr.msra.gmra.mxu1 %vm597_vm5, %v1111_v39  ;;  %v2010_v39 = vld [vmem:[%s2630_s8] ss:$8 sps:$4 sm:$0xff]  }
 0x4f7   : > { %1411 = vmatprep.mubr.bf16.mxu1 %v2170_v18  ;;  %1388 = vmatpush1.bf16.msra.mxu1 %v2001_v33 }
 0x4f8   : > { %1389 = vmatprep.subr.bf16.mxu1 %v2006_v34 }
 0x4fb   : > { %1390 = vmatpush1.bf16.msra.mxu1 %v2004_v35 }
 0x4fc   : > { %1391 = vmatprep.subr.bf16.mxu1 %v2009_v36 }
 0x4ff   : > { %1392 = vmatpush1.bf16.msra.mxu1 %v2007_v37 }
 0x500   : > { %1393 = vmatprep.subr.bf16.mxu1 %v2012_v38 }
 0x503   : > { %1394 = vmatpush1.bf16.msra.mxu1 %v2010_v39 }
 0x575   : > { %v711_v40 = vpop.f32.mrf.mxu1 }
 0x576   : > { %v1802_v41 = vpack.c.bf16 %v711_v40, %v711_v40 }
 0x577   : > { %v1864_v42 = vpop.f32.mrf.mxu1 }
 0x578   : > { %727 = vst.msk [vmem:[#allocation3] sm:$0xf] %vm726_vm6, %v1802_v41 }
 0x579   : > { %v714_v43 = vpop.f32.mrf.mxu1 }
 0x57a   : > { %v1803_v44 = vpack.c.bf16 %v714_v43, %v714_v43 }
 0x57b   : > { %v1865_v45 = vpop.f32.mrf.mxu1 }
 0x57c   : > { %728 = vst.msk [vmem:[#allocation3 + $0x4] sm:$0xf] %vm726_vm6, %v1803_v44 }
 0x5a6   : > { %v857_v47 = vpop.f32.mrf.mxu1 }
 0x5a7   : > { %v1804_v48 = vpack.c.bf16 %v857_v47, %v857_v47 }
 0x5a8   : > { %v1876_v49 = vpop.f32.mrf.mxu1 }
 0x5a9   : > { %870 = vrot.lane.b32.xlu1 %v1804_v48, %s2179_s16  ;;  %v1766_v49 = vld [vmem:[%s2628_s6] ss:$0 sm:$0xff] }
 0x5aa   : > { %v860_v51 = vpop.f32.mrf.mxu1 }
 0x5ab   : > { %v1805_v18 = vpack.c.bf16 %v860_v51, %v860_v51 }
 0x5ac   : > { %v1877_v52 = vpop.f32.mrf.mxu1 }
 0x5ad   : > { %872 = vrot.lane.b32.xlu1 %v1805_v18, %s2179_s16  ;;  %v1767_v52 = vld [vmem:[%s2629_s7] ss:$0 sm:$0xff] }
 0x5ae   : > { %v1007_v54 = vpop.f32.mrf.mxu1 }
 0x5af   : > { %v1806_v55 = vpack.c.bf16 %v1007_v54, %v1007_v54 }
 0x5b0   : > { %v1888_v56 = vpop.f32.mrf.mxu1 }
 0x5b1   : > { %1020 = vrot.lane.b32.xlu0 %v1806_v55, %s2177_s28 }
 0x5b2   : > { %v1010_v58 = vpop.f32.mrf.mxu1 }
 0x5b3   : > { %v1807_v60 = vpack.c.bf16 %v1010_v58, %v1010_v58  ;;  %v2014_v58 = vld [vmem:[%s2632_s10 + $0x38] sm:$0xff]  }
 0x5b4   : > { %v1889_v61 = vpop.f32.mrf.mxu1 }
 0x5b5   : > { %1022 = vrot.lane.b32.xlu1 %v1807_v60, %s2177_s28  ;;  %v2016_v60 = vld [vmem:[%s2632_s10 + $0x30] sm:$0xff]   ;;  %v2017_v61 = vld [vmem:[%s2632_s10 + $0x68] sm:$0xff]   ;;  %s1810_s28 = sshll.u32 %s2269_s25, 8  ;;  %s2582_s25 = scalar_lea.sflag [#allocation6], %s417_s29 }
 0x5b6   : > { %v1157_v62 = vpop.f32.mrf.mxu1  ;;  %s2576_s26 = scalar_lea.hbm %s2634_s12, %s1810_s28 }
 0x5b7   : > { %v1808_v2 = vpack.c.bf16 %v1157_v62, %v1157_v62  ;;  %v2018_v62 = vld [vmem:[%s2632_s10 + $0x28] sm:$0xff]  }
 0x5b8   : > { %v1900_v3 = vpop.f32.mrf.mxu1 }
 0x5b9   : > { %1170 = vrot.lane.b32.xlu0 %v1808_v2, %s2173_s15  ;;  %v2019_v2 = vld [vmem:[%s2632_s10 + $0x60] sm:$0xff]  }
 0x5ba   : > { %v1160_v4 = vpop.f32.mrf.mxu1  ;;  %v2020_v3 = vld [vmem:[%s2632_s10 + $0x20] sm:$0xff]  }
 0x5bb   : > { %v1809_v63 = vpack.c.bf16 %v1160_v4, %v1160_v4  ;;  %v2021_v4 = vld [vmem:[%s2632_s10 + $0x58] sm:$0xff]  }
 0x5bc   : > { %v1901_v5 = vpop.f32.mrf.mxu1 }
 0x5bd   : > { %1172 = vrot.lane.b32.xlu1 %v1809_v63, %s2173_s15  ;;  %v2022_v63 = vld [vmem:[%s2632_s10 + $0x18] sm:$0xff]   ;;  %v2023_v5 = vld [vmem:[%s2632_s10 + $0x50] sm:$0xff]   ;;  %s419_s15 = scalar_lea.vmem [#allocation7], %s1719_s19  ;;  %s2107_s19 = sshll.u32 %s2180_s0, 4  ;;  %s2108_s19 = int_to_ptr.vmem [resolvable:$false] %s2107_s19 }
 0x5be   : > { %s1639_s16 = sshll.u32 %s419_s15, 4  ;;  %s2109_s28 = scalar_lea.vmem %s2108_s19, 512  ;;  %s2578_s16 = int_to_ptr.vmem [resolvable:$true] %s1639_s16 }
 0x5bf   : > { %s2103_s18 = scalar_lea.vmem %s2578_s16, 256  ;;  %p2110_p13 = scmp.lt.s32.totalorder %s2578_s16, %s2108_s19 }
 0x5c0   : > { %p2104_p9 = scmp.ne.s32.totalorder %s2578_s16, %s2103_s18  ;;  %p2111_p0 = scmp.lt.s32.totalorder %s2109_s28, %s2103_s18 }
 0x5c2   : > { %p2105_p10 = pnand %p2104_p9, %p2286_p5  ;;  %p2112_p1 = por %p2111_p0, %p2110_p13 }
 0x5c4   : > { %p2106_p12 = pneg %p2105_p10 }
 0x5c6   : > { %p2113_p2 = pnand %p2112_p1, %p2106_p12 }
 0x61b   : > { %v871_v6 = vpop.permute.xlu1 %870 }
 0x61c   : > { %877 = vst.msk [vmem:[#allocation3] sm:$0xf] %vm876_vm7, %v871_v6  ;;  %v2024_v6 = vld [vmem:[%s2632_s10 + $0x10] sm:$0xff]  }
 0x61f   : > { %v873_v7 = vpop.permute.xlu1 %872 }
 0x620   : > { %878 = vst.msk [vmem:[#allocation3 + $0x4] sm:$0xf] %vm876_vm7, %v873_v7  ;;  %v2025_v7 = vld [vmem:[%s2632_s10 + $0x48] sm:$0xff]  }
 0x623   : > { %v1021_v46 = vpop.permute.xlu0 %1020 }
 0x624   : > { %1027 = vst.msk [vmem:[#allocation3] sm:$0xf] %vm1026_vm8, %v1021_v46  ;;  %v2026_v46 = vld [vmem:[%s2632_s10 + $0x8] sm:$0xff]  }
 0x627   : > { %v1023_v8 = vpop.permute.xlu1 %1022 }
 0x628   : > { %1028 = vst.msk [vmem:[#allocation3 + $0x4] sm:$0xf] %vm1026_vm8, %v1023_v8  ;;  %v2027_v8 = vld [vmem:[%s2632_s10 + $0x40] sm:$0xff]  }
 0x62b   : > { %v1171_v9 = vpop.permute.xlu0 %1170 }
 0x62c   : > { %1177 = vst.msk [vmem:[#allocation3] sm:$0xf] %vm1176_vm9, %v1171_v9  ;;  %v2028_v9 = vld [vmem:[%s2632_s10] sm:$0xff]  }
 0x62f   : > { %v1173_v10 = vpop.permute.xlu1 %1172 }
 0x630   : > { %1178 = vst.msk [vmem:[#allocation3 + $0x4] sm:$0xf] %vm1176_vm9, %v1173_v10  ;;  %v1326_v10 = vlaneseq }
 0x637   : > { %v2000_v11 = vld [vmem:[#allocation3] sm:$0xff]  }
 0x638   : > { %1911 = vmatmul.mubr.msk.bf16.vlgmr.msra.gmra.mxu0 %vm430_vm0, %v2000_v11  ;;  %v1327_v11 = vshrl.u32 %v1326_v10, 7 }
 0x639   : > { %1833 = vmatpush3.bf16.msra.mxu0 %v2014_v58 }
 0x63a   : > { %1834 = vmatprep.subr.bf16.mxu0 %v2015_v59 }
 0x63d   : > { %1835 = vmatpush3.bf16.msra.mxu0 %v2016_v60 }
 0x63e   : > { %1836 = vmatprep.subr.bf16.mxu0 %v2017_v61 }
 0x641   : > { %1837 = vmatpush3.bf16.msra.mxu0 %v2018_v62 }
 0x642   : > { %1838 = vmatprep.subr.bf16.mxu0 %v2019_v2 }
 0x645   : > { %1839 = vmatpush3.bf16.msra.mxu0 %v2020_v3 }
 0x646   : > { %1840 = vmatprep.subr.bf16.mxu0 %v2021_v4 }
 0x649   : > { %1841 = vmatpush3.bf16.msra.mxu0 %v2022_v63 }
 0x64a   : > { %1842 = vmatprep.subr.bf16.mxu0 %v2023_v5 }
 0x64d   : > { %1843 = vmatpush3.bf16.msra.mxu0 %v2024_v6 }
 0x64e   : > { %1844 = vmatprep.subr.bf16.mxu0 %v2025_v7 }
 0x651   : > { %1845 = vmatpush3.bf16.msra.mxu0 %v2026_v46 }
 0x652   : > { %1846 = vmatprep.subr.bf16.mxu0 %v2027_v8 }
 0x655   : > { %1847 = vmatpush3.bf16.msra.mxu0 %v2028_v9 }
 0x6f8   : > { %v1262_v13 = vpop.f32.mrf.mxu0 }
 0x6f9   : > { %v1263_v14 = vadd.f32 %v1759_v12, %v1262_v13  ;;  %v1324_v13 = vld [vmem:[%s2631_s9] sm:$0x3] }
 0x6fa   : > { %v1912_v15 = vpop.f32.mrf.mxu0 }
 0x6fb   : > { %v2471_v16 = vadd.f32 %v1263_v14, %v2319_v0  ;;  %v1332_v14 = vsub.s32 1, %v1327_v11 }
 0x6fc   : > { %v1265_v17 = vpop.f32.mrf.mxu0 }
 0x6fd   : > { %v1266_v19 = vadd.f32 %v1759_v12, %v1265_v17  ;;  %v1273_v20 = vsel %vm430_vm0, %v2471_v16, 0.0  ;;  %v1328_v12 = vsub.s32 0, %v1327_v11  ;;  %v1333_v17 = vrot.slane %v1324_v13, %v1332_v14 }
 0x6fe   : > { %1274 = vadd.xlane.f32.xlu0 %v1273_v20  ;;  %v1913_v21 = vpop.f32.mrf.mxu0 }
 0x6ff   : > { %v2476_v22 = vadd.f32 %v1266_v19, %v2321_v1  ;;  %v1329_v15 = vrot.slane %v1324_v13, %v1328_v12 }
 0x701   : > { %v1276_v23 = vsel %vm430_vm0, %v2476_v22, 0.0 }
 0x702   : > { %1277 = vadd.xlane.f32.xlu1 %v1276_v23 }
 0x787   : > { %v1275_v24 = vpop.xlane.xlu0 %1274 }
 0x788   : > { %v1279_v25 = vmul.f32 0.015625, %v1275_v24 }
 0x78a   : > { %v1281_v26 = vsub.f32 %v2471_v16, %v1279_v25 }
 0x78b   : > { %v1278_v0 = vpop.xlane.xlu1 %1277 }
 0x78c   : > { %v1280_v27 = vmul.f32 0.015625, %v1278_v0  ;;  %v1283_v28 = vmul.f32 %v1281_v26, %v1281_v26 }
 0x78e   : > { %v1282_v29 = vsub.f32 %v2476_v22, %v1280_v27  ;;  %v1285_v30 = vsel %vm430_vm0, %v1283_v28, 0.0 }
 0x78f   : > { %1286 = vadd.xlane.f32.xlu0 %v1285_v30 }
 0x790   : > { %v1284_v31 = vmul.f32 %v1282_v29, %v1282_v29 }
 0x792   : > { %v1288_v1 = vsel %vm430_vm0, %v1284_v31, 0.0 }
 0x793   : > { %1289 = vadd.xlane.f32.xlu0 %v1288_v1 }
 0x818   : > { %v1287_v40 = vpop.xlane.xlu0 %1286 }
 0x819   : > { %v1291_v41 = vmul.f32 0.015625, %v1287_v40 }
 0x81b   : > { %v1293_v42 = vadd.f32 1e-05, %v1291_v41 }
 0x81c   : > { %v1290_v43 = vpop.xlane.xlu0 %1289 }
 0x81d   : > { %2065 = vrsqrt.f32 %v1293_v42  ;;  %v1292_v44 = vmul.f32 0.015625, %v1290_v43 }
 0x81f   : > { %v1294_v45 = vadd.f32 1e-05, %v1292_v44 }
 0x821   : > { %2067 = vrsqrt.f32 %v1294_v45 }
 0x82a   : > { %v2066_v47 = vpop.eup %2065 }
 0x82b   : > { %v1297_v48 = vmul.f32 %v2066_v47, %v1281_v26 }
 0x82d   : > { %v1305_v18 = vmul.f32 %v1766_v49, %v1297_v48 }
 0x82e   : > { %v2068_v50 = vpop.eup %2067 }
 0x82f   : > { %v1298_v51 = vmul.f32 %v2068_v50, %v1282_v29  ;;  %v1313_v54 = vadd.f32 %v1767_v52, %v1305_v18  ;;  %v1777_v50 = vld [vmem:[%s2633_s11] ss:$0 sm:$0xff] }
 0x831   : > { %v1306_v53 = vmul.f32 %v1766_v49, %v1298_v51 }
 0x833   : > { %v1314_v55 = vadd.f32 %v1767_v52, %v1306_v53 }
 0x835   : > { %v1315_v56 = vpack.c.bf16 %v1314_v55, %v1313_v54 }
 0x837   : > { %1776 = vmatmul.mubr.msk.bf16.vlgmr.msra.gmra.mxu1 %vm430_vm0, %v1315_v56 }
 0x8f7   : > { %v1413_v19 = vpop.f32.mrf.mxu1 }
 0x8f8   : > { %v1414_v20 = vadd.f32 %v1413_v19, %v1329_v15 }
 0x8f9   : > { %v1415_v21 = vpop.f32.mrf.mxu1 }
 0x8fa   : > { %v1416_v23 = vadd.f32 %v1415_v21, %v1333_v17  ;;  %v1427_v24 = vmul.f32 0.70710677, %v1414_v20  ;;  %v1422_v41 = vmul.f32 0.5, %v1414_v20 }
 0x8fb   : > { %v1417_v25 = vpop.f32.mrf.mxu1 }
 0x8fc   : > { %v1428_v26 = vmul.f32 0.70710677, %v1416_v23  ;;  %v1418_v0 = vadd.f32 %v1417_v25, %v1329_v15  ;;  %v1423_v38 = vmul.f32 0.5, %v1416_v23 }
 0x8fd   : > { %v1419_v27 = vpop.f32.mrf.mxu1 }
 0x8fe   : > { %2069 = verf.f32 %v1428_v26  ;;  %v1429_v28 = vmul.f32 0.70710677, %v1418_v0  ;;  %v1420_v29 = vadd.f32 %v1419_v27, %v1333_v17  ;;  %v1424_v37 = vmul.f32 0.5, %v1418_v0 }
 0x8ff   : > { %2071 = verf.f32 %v1427_v24 }
 0x900   : > { %2073 = verf.f32 %v1429_v28  ;;  %v1430_v30 = vmul.f32 0.70710677, %v1420_v29  ;;  %v1425_v39 = vmul.f32 0.5, %v1420_v29 }
 0x902   : > { %2075 = verf.f32 %v1430_v30 }
 0x90b   : > { %v2070_v31 = vpop.eup %2069 }
 0x90c   : > { %v2072_v1 = vpop.eup %2071  ;;  %v1436_v33 = vadd.f32 1.0, %v2070_v31 }
 0x90d   : > { %v2074_v32 = vpop.eup %2073  ;;  %v1435_v36 = vadd.f32 1.0, %v2072_v1 }
 0x90e   : > { %v1437_v34 = vadd.f32 1.0, %v2074_v32  ;;  %v1440_v43 = vmul.f32 %v1436_v33, %v1423_v38 }
 0x90f   : > { %v2076_v35 = vpop.eup %2075  ;;  %v1439_v45 = vmul.f32 %v1435_v36, %v1422_v41 }
 0x910   : > { %v1438_v40 = vadd.f32 1.0, %v2076_v35  ;;  %v1441_v42 = vmul.f32 %v1437_v34, %v1424_v37 }
 0x912   : > { %v1442_v44 = vmul.f32 %v1438_v40, %v1425_v39  ;;  %v1443_v48 = vpack.c.bf16 %v1441_v42, %v1439_v45 }
 0x914   : > { %v1444_v47 = vpack.c.bf16 %v1442_v44, %v1440_v43 }
 0x916   : > { %1612 = vmatprep.mubr.bf16.mxu0 %v1444_v47 }
 0x917   : > { %1613 = vmatmul.mubr.bf16.vlgmr.msra.gmra.mxu0 %v1443_v48 }
 0x9d7   : > { %v1848_v49 = vpop.f32.mrf.mxu0 }
 0x9d9   : > { %v1849_v51 = vpop.f32.mrf.mxu0 }
 0x9da   : > { %v1850_v18 = vadd.f32 %v1849_v51, %v1848_v49 }
 0x9db   : > { %v1851_v52 = vpop.f32.mrf.mxu0 }
 0x9dc   : > { %v1615_v53 = vadd.f32 %v1850_v18, %v1777_v50 }
 0x9dd   : > { %v1852_v54 = vpop.f32.mrf.mxu0 }
 0x9de   : > { %v1621_v55 = vadd.f32 %v1615_v53, %v2471_v16  ;;  %v1853_v56 = vadd.f32 %v1852_v54, %v1851_v52 }
 0x9e0   : > { %1623 = vst.msk [vmem:[%s419_s15] sm:$0xff] %vm430_vm0, %v1621_v55  ;;  %v1618_v57 = vadd.f32 %v1853_v56, %v1777_v50 }
 0x9e2   : > { %v1622_v58 = vadd.f32 %v1618_v57, %v2476_v22 }
 0x9e4   : > { %1624 = vst.msk [vmem:[%s419_s15 + $0x8] sm:$0xff] %vm430_vm0, %v1622_v58 }
 0x9e5   : > { %2116 = shalt.err (!%p2113_p2)
}
 0x9e6   : > { %s2117_s29 = scalar_lea.hbm %s2576_s26, 256  ;;  %s2121_s20 = scalar_lea.hbm %s2634_s12, 512 }
 0x9e7   : > { %p2118_p3 = scmp.ne.s32.totalorder %s2576_s26, %s2117_s29  ;;  %p2122_p8 = scmp.lt.s32.totalorder %s2576_s26, %s2634_s12 }
 0x9e8   : > { %p2123_p11 = scmp.lt.s32.totalorder %s2121_s20, %s2117_s29 }
 0x9e9   : > { %p2119_p4 = pnand %p2118_p3, %p2286_p5 }
 0x9ea   : > { %p2124_p9 = por %p2123_p11, %p2122_p8 }
 0x9eb   : > { %p2120_p7 = pneg %p2119_p4 }
 0x9ed   : > { %p2125_p10 = pnand %p2124_p9, %p2120_p7 }
 0x9ef   : > { %2128 = shalt.err (!%p2125_p10)
}
 0x9f0   : > { %s2181_s18 = smov 128   ;;  %s2182_s19 = smov 8  }
 0x9f1   : > { %1918 = dma.vmem_to_hbm [thread:$0]  (%p2286_p5), %s2578_s16, 256, %s2576_s26, %s2582_s25, %s2181_s18, %s2181_s18, %s2182_s19  }
 0x9f2 PF: > { %p1930_p12 = scmp.ge.s32.totalorder %s2167_s24, 2  ;;  %s1654_s28 = sand.u32 1, %s2155_s21  }
 0x9f3   : > { %s1655_s1 = scalar_lea.sflag [#allocation6], %s1654_s28 }
 0x9f4   : > { %p1925_p13 = pnand %p1930_p12, %p2290_p6 }
 0x9f6   : > { %p1926_p0 = pneg %p1925_p13 }
 0x9f8   : > { %2150 = dma.done.wait (%p1926_p0), %s1655_s1, 256  }
 0x9f9   : > { %2152 = vsyncadd (%p1926_p0), %s1655_s1, 4294967040  ;;  %p23_p1 = scmp.ge.s32.totalorder %s2273_s27, 4   ;;  %s2642_s21 = smov %s2159_s22 }
 0x9fa   : > { %s2643_s22 = smov %s2163_s23  ;;  %s2644_s23 = smov %s2284_s30 }
 0x9fb   : > { %s2645_s24 = smov %s2273_s27  ;;  %25 = sbr.rel (!%p23_p1) target bundleno = 7 (0x7), region = 108 }
 0xa00   :  { %1660 = vsyncpa [#allocation5], 1 }
 0xa01   :  { %1662 = vsyncpa [#allocation5 + $0x1], 1 }
 0xa02   :  { %1663 = vsyncpa [#allocation6], 1 }
 0xa03   :  { %1665 = vsyncpa [#allocation6 + $0x1], 1 }

// kernel: tpu_custom_call.1
= control target key start
LH: loop header
LB: loop body
LE: loop exit
PB: predicated region body
PF: predicated region fallthrough
CT: control target
= control target key end

     0   :  { %s2622_s0 = inlined_call_operand.vmem [shape: f32[2,16,64], index: 0, kind: input, shape index: {}]   ;;  %s2623_s1 = inlined_call_operand.hbm [shape: f32[1,64], index: 1, kind: input, shape index: {}]   ;;  %s2624_s2 = inlined_call_operand.vmem [shape: f32[1,64], index: 2, kind: input, shape index: {}]   ;;  %s2625_s3 = inlined_call_operand.vmem [shape: bf16[64,192], index: 3, kind: input, shape index: {}]   ;;  %s2626_s4 = inlined_call_operand.vmem [shape: bf16[64,64], index: 4, kind: input, shape index: {}]   ;;  %s2627_s5 = inlined_call_operand.vmem [shape: f32[1,64], index: 5, kind: input, shape index: {}]   ;;  %s2628_s6 = inlined_call_operand.vmem [shape: f32[1,64], index: 6, kind: input, shape index: {}]   ;;  %s2629_s7 = inlined_call_operand.vmem [shape: f32[1,64], index: 7, kind: input, shape index: {}]   ;;  %s2630_s8 = inlined_call_operand.vmem [shape: bf16[64,256], index: 8, kind: input, shape index: {}]   ;;  %s2631_s9 = inlined_call_operand.vmem [shape: f32[1,256], index: 9, kind: input, shape index: {}]   ;;  %s2632_s10 = inlined_call_operand.vmem [shape: bf16[256,64], index: 10, kind: input, shape index: {}]   ;;  %s2633_s11 = inlined_call_operand.vmem [shape: f32[1,64], index: 11, kind: input, shape index: {}]   ;;  %s2634_s12 = inlined_call_operand.hbm [shape: f32[2,16,64], index: 12, kind: output, shape index: {}]  }
   0x1   :  { %2635 = sst [smem:[#allocation10_spill]] %s2622_s0 }
   0x2   :  { %2636 = sst [smem:[#allocation11_spill]] %s2623_s1 }
   0x3   :  { %17 = vsyncpa [#allocation5], 0 }
   0x4   :  { %18 = vsyncpa [#allocation6], 0 }
   0x5   :  { %20 = vsyncpa [#allocation6 + $0x1], 0  ;;  %s2248_s21 = smov 0   ;;  %s2250_s22 = smov 0  }
   0x6   :  { %s2252_s23 = smov 0   ;;  %s2254_s24 = smov 0  }
   0x7 LB: > { %s2269_s25 = sadd.s32 4294967295, %s2167_s24   ;;  %s1713_s26 = sadd.s32 4294967294, %s2167_s24   ;;  %s2167_s24 = sphi %s2254_s24, %s2645_s24   ;;  %s2163_s23 = sphi %s2252_s23, %s2644_s23   ;;  %s2159_s22 = sphi %s2250_s22, %s2643_s22   ;;  %s2155_s21 = sphi %s2248_s21, %s2642_s21  }
   0x8   : > { %s2273_s27 = sadd.s32 1, %s2167_s24   ;;  %s290_s28 = sadd.s32 1, %s2163_s23 }
   0x9   : > { %s287_s29 = ssub.s32 %s2167_s24, %s2273_s27  ;;  %p300_p0 = scmp.ne.s32.totalorder %s2163_s23, %s2159_s22 }
   0xa   : > { %p288_p1 = scmp.eq.s32.totalorder %s287_s29, 0  ;;  %p301_p2 = scmp.eq.s32.totalorder %s2269_s25, 1 }
   0xb   : > { %p306_p3 = scmp.ne.s32.totalorder %s2159_s22, %s2155_s21  ;;  %p307_p4 = scmp.eq.s32.totalorder %s1713_s26, 1 }
   0xc   : > { %s2284_s30 = scalar_select %p288_p1, %s2163_s23, %s290_s28  }
   0xd   : > { %p2286_p5 = por %p301_p2, %p300_p0  ;;  %p2290_p6 = por %p307_p4, %p306_p3 }
   0xe   : > { %p1714_p7 = scmp.ge.s32.totalorder %s2167_s24, 1  ;;  %p314_p8 = scmp.lt.s32.totalorder %s2167_s24, 3 }
   0xf   : > { %p1928_p9 = scmp.eq.s32.totalorder %s2269_s25, 0  ;;  %s2169_s16 = smov [#allocation4]  }
  0x10   : > { %p2297_p10 = pnand %p1714_p7, %p314_p8  ;;  %s327_s17 = sshll.u32 %s2169_s16, 4  ;;  %s328_s17 = int_to_ptr.vmem [resolvable:$true] %s327_s17 }
  0x11   : > { %s2088_s18 = scalar_lea.vmem %s328_s17, 16  ;;  %s2095_s19 = scalar_lea.vmem %s328_s17, 32 }
  0x12   : > { %p1920_p11 = pneg %p2297_p10  ;;  %p2089_p0 = scmp.ne.s32.totalorder %s328_s17, %s2088_s18 }
  0x13   : > { %p2096_p3 = scmp.lt.s32.totalorder %s328_s17, %s328_s17  ;;  %p2097_p4 = scmp.lt.s32.totalorder %s2095_s19, %s2088_s18 }
  0x14   : > { %p1921_p12 = pnand %p1928_p9, %p1920_p11 }
  0x15   : > { %p2098_p7 = por %p2097_p4, %p2096_p3 }
  0x16   : > { %p2079_p13 = pneg %p1921_p12 }
  0x18   : > { %p2091_p1 = pnand %p2089_p0, %p2079_p13 }
  0x1a   : > { %p2092_p2 = pneg %p2091_p1 }
  0x1c   : > { %p2099_p8 = pnand %p2098_p7, %p2092_p2 }
  0x1e   : > { %2102 = shalt.err (!%p2099_p8)
}
  0x1f   : > { %s2640_s1 = sld [smem:[#allocation11_spill]] }
  0x21   : > { %378 = sbr.rel (%p2297_p10) target bundleno = 2546 (0x9f2), region = 68 }
  0x25   : > { %1923 = dma.hbm_to_vmem [thread:$0]  (!%p1921_p12), %s2640_s1, 16, %s328_s17, [#allocation5]  }
  0x26   : > { %2146 = dma.done.wait (%p1928_p9), [#allocation5], 16  }
  0x27   : > { %2148 = vsyncadd (%p1928_p9), [#allocation5], 4294967280  ;;  %p420_p11 = scmp.lt.s32.totalorder %s2269_s25, 1  ;;  %s2641_s0 = sld [smem:[#allocation10_spill]]  ;;  %vm430_vm0 = vcmask 523264   ;;  %v2170_v18 = vmov 0  }
  0x28   : > { %v1976_v14 = vld [vmem:[%s2625_s3 + $0x34] ss:$8 sps:$4 sm:$0xff]   ;;  %v1978_v15 = vld [vmem:[%s2625_s3 + $0x30] ss:$8 sps:$4 sm:$0xff]   ;;  %v1979_v16 = vld [vmem:[%s2625_s3 + $0x24] ss:$8 sps:$4 sm:$0xff]   ;;  %558 = vmatprep.mubr.bf16.mxu1 %v2170_v18 }
  0x29   : > { %s421_s28 = scalar_select %p420_p11, %s2269_s25, 1  ;;  %534 = vmatprep.subr.bf16.mxu1 %v1976_v14  ;;  %v1981_v17 = vld [vmem:[%s2625_s3 + $0x20] ss:$8 sps:$4 sm:$0xff]   ;;  %v1982_v19 = vld [vmem:[%s2625_s3 + $0x14] ss:$8 sps:$4 sm:$0xff]   ;;  %vm581_vm1 = vcmask 1043456  }
  0x2a   : > { %535 = vmatpush1.bf16.msra.mxu1 %v1978_v15  ;;  %v1984_v20 = vld [vmem:[%s2625_s3 + $0x10] ss:$8 sps:$4 sm:$0xff]   ;;  %v1985_v21 = vld [vmem:[%s2625_s3 + $0x4] ss:$8 sps:$4 sm:$0xff]   ;;  %v1987_v22 = vld [vmem:[%s2625_s3] ss:$8 sps:$4 sm:$0xff]  }
  0x2b   : > { %s1799_s29 = sshll.u32 %s421_s28, 4  ;;  %536 = vmatprep.subr.bf16.mxu1 %v1979_v16  ;;  %v1722_v31 = vld [vmem:[#allocation4] ss:$0 sm:$0xff]  ;;  %v1723_v35 = vld [vmem:[%s2624_s2] ss:$0 sm:$0xff]  ;;  %vm582_vm2 = vcmask 523268  }
  0x2c   : > { %vm583_vm3 = vmor %vm582_vm2, %vm581_vm1  ;;  %v2171_v46 = vmov 0.0   ;;  %vm2172_vm4 = vmmov 0   ;;  %s2173_s15 = smov 48   ;;  %s2174_s17 = smov 64   ;;  %vm597_vm5 = vcmask 130048   ;;  %vm726_vm6 = vcmask 125952  }
  0x2d   : > { %s424_s19 = scalar_lea.vmem %s2641_s0, %s1799_s29  ;;  %1866 = vmatprep.subr.bf16.mxu0 %v2171_v46  ;;  %1868 = vmatprep.mubr.msk.bf16.mxu0 %vm2172_vm4, %v2171_v46  ;;  %s2175_s20 = smov 112   ;;  %vm876_vm7 = vcmask 257152   ;;  %vm1026_vm8 = vcmask 388352   ;;  %vm1176_vm9 = vcmask 519552  }
  0x2e   : > { %v2319_v0 = vld [vmem:[%s424_s19] sm:$0xff]  ;;  %v2321_v1 = vld [vmem:[%s424_s19 + $0x8] sm:$0xff]  ;;  %537 = vmatpush1.bf16.msra.mxu1 %v1981_v17  ;;  %s2176_s26 = smov 96   ;;  %s2177_s28 = smov 32  }
  0x2f   : > { %v431_v2 = vsel %vm430_vm0, %v2319_v0, 0.0  ;;  %v434_v3 = vsel %vm430_vm0, %v2321_v1, 0.0  ;;  %538 = vmatprep.subr.bf16.mxu1 %v1982_v19  ;;  %s2178_s29 = smov 80   ;;  %s2179_s16 = smov 16  }
  0x30   : > { %432 = vadd.xlane.f32.xlu0 %v431_v2  ;;  %s2180_s0 = smov [#allocation7]  }
  0x32   : > { %539 = vmatpush1.bf16.msra.mxu1 %v1984_v20 }
  0x33   : > { %540 = vmatprep.subr.bf16.mxu1 %v1985_v21 }
  0x34   : > { %435 = vadd.xlane.f32.xlu0 %v434_v3 }
  0x36   : > { %541 = vmatpush1.bf16.msra.mxu1 %v1987_v22 }
  0x37   : > { %1854 = vmatprep.subr.bf16.mxu1 %v2171_v46 }
  0xb9   : > { %v433_v4 = vpop.xlane.xlu0 %432 }
  0xba   : > { %v438_v5 = vmul.f32 0.015625, %v433_v4 }
  0xbc   : > { %v440_v6 = vsub.f32 %v2319_v0, %v438_v5 }
  0xbd   : > { %v436_v7 = vpop.xlane.xlu0 %435 }
  0xbe   : > { %v439_v8 = vmul.f32 0.015625, %v436_v7  ;;  %v442_v9 = vmul.f32 %v440_v6, %v440_v6 }
  0xc0   : > { %v441_v10 = vsub.f32 %v2321_v1, %v439_v8  ;;  %v444_v11 = vsel %vm430_vm0, %v442_v9, 0.0 }
  0xc1   : > { %445 = vadd.xlane.f32.xlu1 %v444_v11 }
  0xc2   : > { %v443_v12 = vmul.f32 %v441_v10, %v441_v10 }
  0xc4   : > { %v447_v13 = vsel %vm430_vm0, %v443_v12, 0.0 }
  0xc5   : > { %448 = vadd.xlane.f32.xlu1 %v447_v13 }
 0x14a   : > { %v446_v23 = vpop.xlane.xlu1 %445 }
 0x14b   : > { %v450_v24 = vmul.f32 0.015625, %v446_v23 }
 0x14d   : > { %v452_v25 = vadd.f32 1e-05, %v450_v24 }
 0x14e   : > { %v449_v26 = vpop.xlane.xlu1 %448 }
 0x14f   : > { %2029 = vrsqrt.f32 %v452_v25  ;;  %v451_v27 = vmul.f32 0.015625, %v449_v26 }
 0x151   : > { %v453_v28 = vadd.f32 1e-05, %v451_v27 }
 0x153   : > { %2031 = vrsqrt.f32 %v453_v28 }
 0x15c   : > { %v2030_v29 = vpop.eup %2029 }
 0x15d   : > { %v456_v30 = vmul.f32 %v2030_v29, %v440_v6 }
 0x15f   : > { %v464_v34 = vmul.f32 %v1722_v31, %v456_v30 }
 0x160   : > { %v2032_v32 = vpop.eup %2031 }
 0x161   : > { %v457_v33 = vmul.f32 %v2032_v32, %v441_v10  ;;  %v472_v37 = vadd.f32 %v1723_v35, %v464_v34 }
 0x163   : > { %v465_v36 = vmul.f32 %v1722_v31, %v457_v33 }
 0x165   : > { %v473_v38 = vadd.f32 %v1723_v35, %v465_v36 }
 0x167   : > { %v474_v39 = vpack.c.bf16 %v473_v38, %v472_v37 }
 0x169   : > { %1732 = vmatmul.mubr.msk.bf16.vlgmr.msra.gmra.mxu1 %vm430_vm0, %v474_v39 }
 0x16a   : > { %1856 = vmatprep.mubr.msk.bf16.mxu1 %vm2172_vm4, %v2171_v46 }
 0x229   : > { %v560_v40 = vpop.f32.mrf.mxu1 }
 0x22b   : > { %v562_v41 = vpop.f32.mrf.mxu1 }
 0x22c   : > { %v1800_v42 = vpack.c.bf16 %v562_v41, %v560_v40 }
 0x22d   : > { %v564_v43 = vpop.f32.mrf.mxu1 }
 0x22e   : > { %584 = vst.msk [vmem:[#allocation2] sm:$0xff] %vm583_vm3, %v1800_v42 }
 0x22f   : > { %v566_v44 = vpop.f32.mrf.mxu1 }
 0x230   : > { %v1801_v45 = vpack.c.bf16 %v566_v44, %v564_v43 }
 0x232   : > { %585 = vst.msk [vmem:[#allocation2 + $0x8] sm:$0xff] %vm583_vm3, %v1801_v45 }
 0x239   : > { %v1988_v47 = vld [vmem:[#allocation2] ss:$8 sps:$4 sm:$0xff]   ;;  %v1992_v58 = vld [vmem:[#allocation2 + $0x4] ss:$8 sps:$4 sm:$0xff]  }
 0x23a   : > { %v1989_v48 = vld [vmem:[#allocation2] ss:$8 sps:$4 sm:$0xff]   ;;  %740 = vrot.lane.b32.xlu1 %v1988_v47, %s2173_s15 }
 0x23b   : > { %595 = vrot.lane.b32.xlu0 %v1989_v48, %s2174_s17  ;;  %v1990_v49 = vld [vmem:[#allocation2] ss:$8 sps:$4 sm:$0xff]  }
 0x23c   : > { %v1991_v50 = vld [vmem:[#allocation2] ss:$8 sps:$4 sm:$0xff]  }
 0x23e   : > { %738 = vrot.lane.b32.xlu1 %v1988_v47, %s2175_s20 }
 0x23f   : > { %888 = vrot.lane.b32.xlu0 %v1990_v49, %s2176_s26 }
 0x242   : > { %890 = vrot.lane.b32.xlu1 %v1990_v49, %s2177_s28 }
 0x243   : > { %1038 = vrot.lane.b32.xlu0 %v1991_v50, %s2178_s29 }
 0x246   : > { %1040 = vrot.lane.b32.xlu1 %v1991_v50, %s2179_s16 }
 0x2ac   : > { %v741_v51 = vpop.permute.xlu1 %740 }
 0x2ad   : > { %v596_v52 = vpop.permute.xlu0 %595  ;;  %v746_v53 = vsel %vm597_vm5, %v741_v51, 0  ;;  %v1993_v51 = vld [vmem:[#allocation2 + $0x4] ss:$8 sps:$4 sm:$0xff]  }
 0x2ae   : > { %v602_v54 = vsel %vm597_vm5, %v596_v52, 0  ;;  %1867 = vmatpush3.bf16.xpose.msra.mxu0 %v746_v53 }
 0x2af   : > { %1855 = vmatpush3.bf16.xpose.msra.mxu1 %v602_v54  ;;  %1878 = vmatprep.subr.bf16.mxu0 %v2171_v46 }
 0x2b0   : > { %v739_v55 = vpop.permute.xlu1 %738  ;;  %1860 = vmatprep.subr.bf16.mxu1 %v2171_v46 }
 0x2b1   : > { %v889_v60 = vpop.permute.xlu0 %888 }
 0x2b4   : > { %v891_v56 = vpop.permute.xlu1 %890 }
 0x2b5   : > { %v896_v57 = vsel %vm597_vm5, %v891_v56, 0  ;;  %1869 = vmatmul.mubr.msk.bf16.vlgmr.msra.gmra.mxu0 %vm597_vm5, %v739_v55  ;;  %v1039_v62 = vpop.permute.xlu0 %1038 }
 0x2b6   : > { %1857 = vmatmul.mubr.msk.bf16.vlgmr.msra.gmra.mxu1 %vm597_vm5, %v1989_v48  ;;  %1879 = vmatpush3.bf16.xpose.msra.mxu0 %v896_v57 }
 0x2b7   : > { %1861 = vmatpush3.bf16.msra.mxu1 %v1992_v58  ;;  %1880 = vmatprep.mubr.msk.bf16.mxu0 %vm2172_vm4, %v2171_v46 }
 0x2b8   : > { %1890 = vmatprep.subr.bf16.mxu0 %v2171_v46  ;;  %1862 = vmatprep.mubr.msk.bf16.mxu1 %vm2172_vm4, %v2171_v46  ;;  %v1041_v59 = vpop.permute.xlu1 %1040 }
 0x2b9   : > { %1872 = vmatprep.subr.bf16.mxu1 %v2171_v46  ;;  %v1046_v61 = vsel %vm597_vm5, %v1041_v59, 0 }
 0x2bd   : > { %1881 = vmatmul.mubr.msk.bf16.vlgmr.msra.gmra.mxu0 %vm597_vm5, %v889_v60 }
 0x2be   : > { %1891 = vmatpush3.bf16.xpose.msra.mxu0 %v1046_v61  ;;  %1892 = vmatprep.mubr.msk.bf16.mxu0 %vm2172_vm4, %v2171_v46 }
 0x2bf   : > { %1902 = vmatprep.subr.bf16.mxu0 %v2171_v46 }
 0x2c5   : > { %1893 = vmatmul.mubr.msk.bf16.vlgmr.msra.gmra.mxu0 %vm597_vm5, %v1039_v62  ;;  %v1994_v62 = vld [vmem:[#allocation2 + $0x4] ss:$8 sps:$4 sm:$0xff]  }
 0x2c6   : > { %1910 = vmatprep.mubr.msk.bf16.mxu0 %vm2172_vm4, %v2171_v46 }
 0x375   : > { %v2393_v63 = vpop.f32.mrf.mxu0 }
 0x376   : > { %v638_v2 = vpop.f32.mrf.mxu1  ;;  %v789_v13 = vsel %vm597_vm5, %v2393_v63, -inf }
 0x377   : > { %v1870_v3 = vpop.f32.mrf.mxu0  ;;  %v645_v4 = vsel %vm597_vm5, %v638_v2, -inf }
 0x378   : > { %646 = vmax.xlane.f32.xlu1 %v645_v4  ;;  %v1858_v5 = vpop.f32.mrf.mxu1 }
 0x379   : > { %v785_v6 = vpop.f32.mrf.mxu0 }
 0x37a   : > { %v641_v7 = vpop.f32.mrf.mxu1  ;;  %v792_v16 = vsel %vm597_vm5, %v785_v6, -inf }
 0x37b   : > { %v1871_v8 = vpop.f32.mrf.mxu0  ;;  %v648_v9 = vsel %vm597_vm5, %v641_v7, -inf }
 0x37c   : > { %649 = vmax.xlane.f32.xlu0 %v648_v9  ;;  %v1859_v10 = vpop.f32.mrf.mxu1 }
 0x37d   : > { %v2397_v11 = vpop.f32.mrf.mxu0 }
 0x37e   : > { %v939_v12 = vsel %vm597_vm5, %v2397_v11, -inf }
 0x37f   : > { %940 = vmax.xlane.f32.xlu1 %v939_v12  ;;  %v1882_v14 = vpop.f32.mrf.mxu0 }
 0x380   : > { %790 = vmax.xlane.f32.xlu0 %v789_v13 }
 0x381   : > { %v935_v15 = vpop.f32.mrf.mxu0 }
 0x382   : > { %v942_v21 = vsel %vm597_vm5, %v935_v15, -inf }
 0x383   : > { %v1883_v17 = vpop.f32.mrf.mxu0 }
 0x384   : > { %793 = vmax.xlane.f32.xlu0 %v792_v16 }
 0x385   : > { %v1082_v19 = vpop.f32.mrf.mxu0 }
 0x386   : > { %v1089_v20 = vsel %vm597_vm5, %v1082_v19, -inf }
 0x387   : > { %1090 = vmax.xlane.f32.xlu1 %v1089_v20  ;;  %v1894_v22 = vpop.f32.mrf.mxu0 }
 0x388   : > { %943 = vmax.xlane.f32.xlu0 %v942_v21 }
 0x389   : > { %v1085_v23 = vpop.f32.mrf.mxu0 }
 0x38a   : > { %v1092_v24 = vsel %vm597_vm5, %v1085_v23, -inf }
 0x38b   : > { %v1895_v25 = vpop.f32.mrf.mxu0 }
 0x38c   : > { %1093 = vmax.xlane.f32.xlu0 %v1092_v24 }
 0x401   : > { %v647_v26 = vpop.xlane.xlu1 %646 }
 0x402   : > { %v651_v27 = vsub.f32 %v638_v2, %v647_v26 }
 0x404   : > { %v653_v28 = vmul.f32 1.442695, %v651_v27 }
 0x405   : > { %v650_v29 = vpop.xlane.xlu0 %649 }
 0x406   : > { %2033 = vpow2.f32 %v653_v28  ;;  %v652_v30 = vsub.f32 %v641_v7, %v650_v29  ;;  %v1995_v7 = vld [vmem:[#allocation2 + $0x4] ss:$8 sps:$4 sm:$0xff]  }
 0x408   : > { %v655_v31 = vmul.f32 1.442695, %v652_v30  ;;  %v941_v55 = vpop.xlane.xlu1 %940 }
 0x409   : > { %v791_v32 = vpop.xlane.xlu0 %790  ;;  %v945_v56 = vsub.f32 %v2397_v11, %v941_v55 }
 0x40a   : > { %2035 = vpow2.f32 %v655_v31  ;;  %v795_v54 = vsub.f32 %v2393_v63, %v791_v32 }
 0x40b   : > { %v947_v59 = vmul.f32 1.442695, %v945_v56 }
 0x40c   : > { %v797_v57 = vmul.f32 1.442695, %v795_v54 }
 0x40d   : > { %v794_v33 = vpop.xlane.xlu0 %793 }
 0x40e   : > { %v796_v34 = vsub.f32 %v785_v6, %v794_v33 }
 0x410   : > { %v799_v35 = vmul.f32 1.442695, %v796_v34  ;;  %v1091_v58 = vpop.xlane.xlu1 %1090 }
 0x411   : > { %v944_v36 = vpop.xlane.xlu0 %943  ;;  %v1095_v60 = vsub.f32 %v1082_v19, %v1091_v58 }
 0x412   : > { %2037 = vpow2.f32 %v799_v35  ;;  %v946_v37 = vsub.f32 %v935_v15, %v944_v36 }
 0x413   : > { %v2034_v38 = vpop.eup %2033  ;;  %v1097_v61 = vmul.f32 1.442695, %v1095_v60 }
 0x414   : > { %v949_v39 = vmul.f32 1.442695, %v946_v37  ;;  %v657_v40 = vsel %vm597_vm5, %v2034_v38, 0.0 }
 0x415   : > { %658 = vadd.xlane.f32.xlu1 %v657_v40  ;;  %v1094_v41 = vpop.xlane.xlu0 %1093 }
 0x416   : > { %2039 = vpow2.f32 %v949_v39  ;;  %v1096_v42 = vsub.f32 %v1085_v23, %v1094_v41 }
 0x417   : > { %v2036_v43 = vpop.eup %2035 }
 0x418   : > { %v1099_v44 = vmul.f32 1.442695, %v1096_v42  ;;  %v660_v45 = vsel %vm597_vm5, %v2036_v43, 0.0 }
 0x419   : > { %661 = vadd.xlane.f32.xlu0 %v660_v45 }
 0x41a   : > { %2041 = vpow2.f32 %v1099_v44 }
 0x41b   : > { %2043 = vpow2.f32 %v797_v57  ;;  %v1998_v57 = vld [vmem:[%s2626_s4 + $0x8] sm:$0xff]  }
 0x41c   : > { %2045 = vpow2.f32 %v947_v59  ;;  %v1999_v59 = vld [vmem:[%s2626_s4] sm:$0xff]  }
 0x41d   : > { %2047 = vpow2.f32 %v1097_v61 }
 0x41f   : > { %v2409_v47 = vpop.eup %2037 }
 0x420   : > { %v804_v48 = vsel %vm597_vm5, %v2409_v47, 0.0 }
 0x421   : > { %805 = vadd.xlane.f32.xlu0 %v804_v48 }
 0x423   : > { %v2413_v49 = vpop.eup %2039 }
 0x424   : > { %v954_v50 = vsel %vm597_vm5, %v2413_v49, 0.0 }
 0x425   : > { %955 = vadd.xlane.f32.xlu0 %v954_v50  ;;  %v1996_v50 = vld [vmem:[%s2626_s4 + $0x18] sm:$0xff]  }
 0x426   : > { %817 = vrot.lane.b32.xlu1 %v1993_v51, %s2175_s20  ;;  %1903 = vmatpush3.bf16.msra.mxu0 %v1996_v50 }
 0x427   : > { %v2418_v52 = vpop.eup %2041  ;;  %1904 = vmatprep.subr.bf16.mxu0 %v2171_v46 }
 0x428   : > { %v1104_v53 = vsel %vm597_vm5, %v2418_v52, 0.0  ;;  %v2044_v2 = vpop.eup %2043 }
 0x429   : > { %1105 = vadd.xlane.f32.xlu0 %v1104_v53  ;;  %v801_v3 = vsel %vm597_vm5, %v2044_v2, 0.0  ;;  %v2046_v4 = vpop.eup %2045  ;;  %v1997_v53 = vld [vmem:[%s2626_s4 + $0x10] sm:$0xff]  }
 0x42a   : > { %v951_v63 = vsel %vm597_vm5, %v2046_v4, 0.0  ;;  %v2048_v5 = vpop.eup %2047  ;;  %1905 = vmatpush3.bf16.msra.mxu0 %v1997_v53 }
 0x42b   : > { %v1101_v6 = vsel %vm597_vm5, %v2048_v5, 0.0  ;;  %1906 = vmatprep.subr.bf16.mxu0 %v2171_v46 }
 0x42e   : > { %1907 = vmatpush3.bf16.msra.mxu0 %v1998_v57  ;;  %v2013_v57 = vld [vmem:[%s2632_s10 + $0x78] sm:$0xff]  }
 0x42f   : > { %1908 = vmatprep.subr.bf16.mxu0 %v2171_v46 }
 0x432   : > { %1909 = vmatpush3.bf16.msra.mxu0 %v1999_v59  ;;  %v2015_v59 = vld [vmem:[%s2632_s10 + $0x70] sm:$0xff]  }
 0x433   : > { %1832 = vmatprep.subr.bf16.mxu0 %v2013_v57 }
 0x43f   : > { %967 = vrot.lane.b32.xlu0 %v1994_v62, %s2176_s26 }
 0x44a   : > { %802 = vadd.xlane.f32.xlu1 %v801_v3 }
 0x44e   : > { %952 = vadd.xlane.f32.xlu1 %v951_v63 }
 0x452   : > { %1102 = vadd.xlane.f32.xlu1 %v1101_v6 }
 0x463   : > { %1117 = vrot.lane.b32.xlu1 %v1995_v7, %s2178_s29  ;;  %s417_s29 = sand.u32 1, %s2159_s22  }
 0x464   : > { %s1719_s19 = sshll.u32 %s417_s29, 4 }
 0x49e   : > { %v659_v8 = vpop.xlane.xlu1 %658 }
 0x49f   : > { %2049 = vrcp.f32 %v659_v8 }
 0x4a2   : > { %v662_v9 = vpop.xlane.xlu0 %661  ;;  %v818_v15 = vpop.permute.xlu1 %817 }
 0x4a3   : > { %2051 = vrcp.f32 %v662_v9 }
 0x4aa   : > { %v806_v16 = vpop.xlane.xlu0 %805 }
 0x4ab   : > { %2053 = vrcp.f32 %v806_v16 }
 0x4ac   : > { %v2050_v10 = vpop.eup %2049 }
 0x4ad   : > { %v665_v12 = vmul.f32 %v2050_v10, %v2034_v38 }
 0x4ae   : > { %v956_v19 = vpop.xlane.xlu0 %955 }
 0x4b0   : > { %v2052_v11 = vpop.eup %2051 }
 0x4b1   : > { %v666_v13 = vmul.f32 %v2052_v11, %v2036_v43 }
 0x4b2   : > { %v1106_v23 = vpop.xlane.xlu0 %1105 }
 0x4b3   : > { %v667_v14 = vpack.c.bf16 %v666_v13, %v665_v12  ;;  %v1759_v12 = vld [vmem:[%s2627_s5] ss:$0 sm:$0xff] }
 0x4b5   : > { %1863 = vmatmul.mubr.msk.bf16.vlgmr.msra.gmra.mxu1 %vm597_vm5, %v667_v14 }
 0x4b6   : > { %1873 = vmatpush3.bf16.msra.mxu1 %v818_v15  ;;  %1874 = vmatprep.mubr.msk.bf16.mxu1 %vm2172_vm4, %v2171_v46  ;;  %v968_v29 = vpop.permute.xlu0 %967 }
 0x4b7   : > { %1884 = vmatprep.subr.bf16.mxu1 %v2171_v46 }
 0x4b8   : > { %v2054_v22 = vpop.eup %2053 }
 0x4b9   : > { %v810_v26 = vmul.f32 %v2054_v22, %v2409_v47 }
 0x4d3   : > { %v803_v17 = vpop.xlane.xlu1 %802 }
 0x4d4   : > { %2055 = vrcp.f32 %v803_v17 }
 0x4d7   : > { %v953_v20 = vpop.xlane.xlu1 %952 }
 0x4d8   : > { %2057 = vrcp.f32 %v953_v20 }
 0x4d9   : > { %2059 = vrcp.f32 %v956_v19 }
 0x4db   : > { %v1103_v21 = vpop.xlane.xlu1 %1102 }
 0x4dc   : > { %2061 = vrcp.f32 %v1103_v21 }
 0x4dd   : > { %2063 = vrcp.f32 %v1106_v23 }
 0x4df   : > { %v1118_v35 = vpop.permute.xlu1 %1117 }
 0x4e1   : > { %v2056_v24 = vpop.eup %2055 }
 0x4e2   : > { %v809_v25 = vmul.f32 %v2056_v24, %v2044_v2 }
 0x4e4   : > { %v811_v27 = vpack.c.bf16 %v810_v26, %v809_v25 }
 0x4e5   : > { %v2058_v28 = vpop.eup %2057 }
 0x4e6   : > { %1875 = vmatmul.mubr.msk.bf16.vlgmr.msra.gmra.mxu1 %vm597_vm5, %v811_v27  ;;  %v2060_v30 = vpop.eup %2059  ;;  %v959_v31 = vmul.f32 %v2058_v28, %v2046_v4 }
 0x4e7   : > { %1885 = vmatpush3.bf16.msra.mxu1 %v968_v29  ;;  %1886 = vmatprep.mubr.msk.bf16.mxu1 %vm2172_vm4, %v2171_v46  ;;  %v960_v32 = vmul.f32 %v2060_v30, %v2413_v49 }
 0x4e8   : > { %1896 = vmatprep.subr.bf16.mxu1 %v2171_v46 }
 0x4e9   : > { %v961_v33 = vpack.c.bf16 %v960_v32, %v959_v31  ;;  %v2062_v34 = vpop.eup %2061  ;;  %v2003_v32 = vld [vmem:[%s2630_s8 + $0x34] ss:$8 sps:$4 sm:$0xff]  }
 0x4ea   : > { %v2064_v36 = vpop.eup %2063  ;;  %v1109_v37 = vmul.f32 %v2062_v34, %v2048_v5  ;;  %v2006_v34 = vld [vmem:[%s2630_s8 + $0x24] ss:$8 sps:$4 sm:$0xff]  }
 0x4eb   : > { %v1110_v38 = vmul.f32 %v2064_v36, %v2418_v52  ;;  %v2009_v36 = vld [vmem:[%s2630_s8 + $0x14] ss:$8 sps:$4 sm:$0xff]  }
 0x4ed   : > { %v1111_v39 = vpack.c.bf16 %v1110_v38, %v1109_v37  ;;  %v2007_v37 = vld [vmem:[%s2630_s8 + $0x10] ss:$8 sps:$4 sm:$0xff]   ;;  %v2012_v38 = vld [vmem:[%s2630_s8 + $0x4] ss:$8 sps:$4 sm:$0xff]  }
 0x4ee   : > { %1887 = vmatmul.mubr.msk.bf16.vlgmr.msra.gmra.mxu1 %vm597_vm5, %v961_v33  ;;  %v2001_v33 = vld [vmem:[%s2630_s8 + $0x30] ss:$8 sps:$4 sm:$0xff]  }
 0x4ef   : > { %1897 = vmatpush3.bf16.msra.mxu1 %v1118_v35  ;;  %1898 = vmatprep.mubr.msk.bf16.mxu1 %vm2172_vm4, %v2171_v46  ;;  %v2004_v35 = vld [vmem:[%s2630_s8 + $0x20] ss:$8 sps:$4 sm:$0xff]  }
 0x4f0   : > { %1387 = vmatprep.subr.bf16.mxu1 %v2003_v32 }
 0x4f6   : > { %1899 = vmatmul.mubr.msk.bf16.vlgmr.msra.gmra.mxu1 %vm597_vm5, %v1111_v39  ;;  %v2010_v39 = vld [vmem:[%s2630_s8] ss:$8 sps:$4 sm:$0xff]  }
 0x4f7   : > { %1411 = vmatprep.mubr.bf16.mxu1 %v2170_v18  ;;  %1388 = vmatpush1.bf16.msra.mxu1 %v2001_v33 }
 0x4f8   : > { %1389 = vmatprep.subr.bf16.mxu1 %v2006_v34 }
 0x4fb   : > { %1390 = vmatpush1.bf16.msra.mxu1 %v2004_v35 }
 0x4fc   : > { %1391 = vmatprep.subr.bf16.mxu1 %v2009_v36 }
 0x4ff   : > { %1392 = vmatpush1.bf16.msra.mxu1 %v2007_v37 }
 0x500   : > { %1393 = vmatprep.subr.bf16.mxu1 %v2012_v38 }
 0x503   : > { %1394 = vmatpush1.bf16.msra.mxu1 %v2010_v39 }
 0x575   : > { %v711_v40 = vpop.f32.mrf.mxu1 }
 0x576   : > { %v1802_v41 = vpack.c.bf16 %v711_v40, %v711_v40 }
 0x577   : > { %v1864_v42 = vpop.f32.mrf.mxu1 }
 0x578   : > { %727 = vst.msk [vmem:[#allocation3] sm:$0xf] %vm726_vm6, %v1802_v41 }
 0x579   : > { %v714_v43 = vpop.f32.mrf.mxu1 }
 0x57a   : > { %v1803_v44 = vpack.c.bf16 %v714_v43, %v714_v43 }
 0x57b   : > { %v1865_v45 = vpop.f32.mrf.mxu1 }
 0x57c   : > { %728 = vst.msk [vmem:[#allocation3 + $0x4] sm:$0xf] %vm726_vm6, %v1803_v44 }
 0x5a6   : > { %v857_v47 = vpop.f32.mrf.mxu1 }
 0x5a7   : > { %v1804_v48 = vpack.c.bf16 %v857_v47, %v857_v47 }
 0x5a8   : > { %v1876_v49 = vpop.f32.mrf.mxu1 }
 0x5a9   : > { %870 = vrot.lane.b32.xlu1 %v1804_v48, %s2179_s16  ;;  %v1766_v49 = vld [vmem:[%s2628_s6] ss:$0 sm:$0xff] }
 0x5aa   : > { %v860_v51 = vpop.f32.mrf.mxu1 }
 0x5ab   : > { %v1805_v18 = vpack.c.bf16 %v860_v51, %v860_v51 }
 0x5ac   : > { %v1877_v52 = vpop.f32.mrf.mxu1 }
 0x5ad   : > { %872 = vrot.lane.b32.xlu1 %v1805_v18, %s2179_s16  ;;  %v1767_v52 = vld [vmem:[%s2629_s7] ss:$0 sm:$0xff] }
 0x5ae   : > { %v1007_v54 = vpop.f32.mrf.mxu1 }
 0x5af   : > { %v1806_v55 = vpack.c.bf16 %v1007_v54, %v1007_v54 }
 0x5b0   : > { %v1888_v56 = vpop.f32.mrf.mxu1 }
 0x5b1   : > { %1020 = vrot.lane.b32.xlu0 %v1806_v55, %s2177_s28 }
 0x5b2   : > { %v1010_v58 = vpop.f32.mrf.mxu1 }
 0x5b3   : > { %v1807_v60 = vpack.c.bf16 %v1010_v58, %v1010_v58  ;;  %v2014_v58 = vld [vmem:[%s2632_s10 + $0x38] sm:$0xff]  }
 0x5b4   : > { %v1889_v61 = vpop.f32.mrf.mxu1 }
 0x5b5   : > { %1022 = vrot.lane.b32.xlu1 %v1807_v60, %s2177_s28  ;;  %v2016_v60 = vld [vmem:[%s2632_s10 + $0x30] sm:$0xff]   ;;  %v2017_v61 = vld [vmem:[%s2632_s10 + $0x68] sm:$0xff]   ;;  %s1810_s28 = sshll.u32 %s2269_s25, 8  ;;  %s2582_s25 = scalar_lea.sflag [#allocation6], %s417_s29 }
 0x5b6   : > { %v1157_v62 = vpop.f32.mrf.mxu1  ;;  %s2576_s26 = scalar_lea.hbm %s2634_s12, %s1810_s28 }
 0x5b7   : > { %v1808_v2 = vpack.c.bf16 %v1157_v62, %v1157_v62  ;;  %v2018_v62 = vld [vmem:[%s2632_s10 + $0x28] sm:$0xff]  }
 0x5b8   : > { %v1900_v3 = vpop.f32.mrf.mxu1 }
 0x5b9   : > { %1170 = vrot.lane.b32.xlu0 %v1808_v2, %s2173_s15  ;;  %v2019_v2 = vld [vmem:[%s2632_s10 + $0x60] sm:$0xff]  }
 0x5ba   : > { %v1160_v4 = vpop.f32.mrf.mxu1  ;;  %v2020_v3 = vld [vmem:[%s2632_s10 + $0x20] sm:$0xff]  }
 0x5bb   : > { %v1809_v63 = vpack.c.bf16 %v1160_v4, %v1160_v4  ;;  %v2021_v4 = vld [vmem:[%s2632_s10 + $0x58] sm:$0xff]  }
 0x5bc   : > { %v1901_v5 = vpop.f32.mrf.mxu1 }
 0x5bd   : > { %1172 = vrot.lane.b32.xlu1 %v1809_v63, %s2173_s15  ;;  %v2022_v63 = vld [vmem:[%s2632_s10 + $0x18] sm:$0xff]   ;;  %v2023_v5 = vld [vmem:[%s2632_s10 + $0x50] sm:$0xff]   ;;  %s419_s15 = scalar_lea.vmem [#allocation7], %s1719_s19  ;;  %s2107_s19 = sshll.u32 %s2180_s0, 4  ;;  %s2108_s19 = int_to_ptr.vmem [resolvable:$false] %s2107_s19 }
 0x5be   : > { %s1639_s16 = sshll.u32 %s419_s15, 4  ;;  %s2109_s28 = scalar_lea.vmem %s2108_s19, 512  ;;  %s2578_s16 = int_to_ptr.vmem [resolvable:$true] %s1639_s16 }
 0x5bf   : > { %s2103_s18 = scalar_lea.vmem %s2578_s16, 256  ;;  %p2110_p13 = scmp.lt.s32.totalorder %s2578_s16, %s2108_s19 }
 0x5c0   : > { %p2104_p9 = scmp.ne.s32.totalorder %s2578_s16, %s2103_s18  ;;  %p2111_p0 = scmp.lt.s32.totalorder %s2109_s28, %s2103_s18 }
 0x5c2   : > { %p2105_p10 = pnand %p2104_p9, %p2286_p5  ;;  %p2112_p1 = por %p2111_p0, %p2110_p13 }
 0x5c4   : > { %p2106_p12 = pneg %p2105_p10 }
 0x5c6   : > { %p2113_p2 = pnand %p2112_p1, %p2106_p12 }
 0x61b   : > { %v871_v6 = vpop.permute.xlu1 %870 }
 0x61c   : > { %877 = vst.msk [vmem:[#allocation3] sm:$0xf] %vm876_vm7, %v871_v6  ;;  %v2024_v6 = vld [vmem:[%s2632_s10 + $0x10] sm:$0xff]  }
 0x61f   : > { %v873_v7 = vpop.permute.xlu1 %872 }
 0x620   : > { %878 = vst.msk [vmem:[#allocation3 + $0x4] sm:$0xf] %vm876_vm7, %v873_v7  ;;  %v2025_v7 = vld [vmem:[%s2632_s10 + $0x48] sm:$0xff]  }
 0x623   : > { %v1021_v46 = vpop.permute.xlu0 %1020 }
 0x624   : > { %1027 = vst.msk [vmem:[#allocation3] sm:$0xf] %vm1026_vm8, %v1021_v46  ;;  %v2026_v46 = vld [vmem:[%s2632_s10 + $0x8] sm:$0xff]  }
 0x627   : > { %v1023_v8 = vpop.permute.xlu1 %1022 }
 0x628   : > { %1028 = vst.msk [vmem:[#allocation3 + $0x4] sm:$0xf] %vm1026_vm8, %v1023_v8  ;;  %v2027_v8 = vld [vmem:[%s2632_s10 + $0x40] sm:$0xff]  }
 0x62b   : > { %v1171_v9 = vpop.permute.xlu0 %1170 }
 0x62c   : > { %1177 = vst.msk [vmem:[#allocation3] sm:$0xf] %vm1176_vm9, %v1171_v9  ;;  %v2028_v9 = vld [vmem:[%s2632_s10] sm:$0xff]  }
 0x62f   : > { %v1173_v10 = vpop.permute.xlu1 %1172 }
 0x630   : > { %1178 = vst.msk [vmem:[#allocation3 + $0x4] sm:$0xf] %vm1176_vm9, %v1173_v10  ;;  %v1326_v10 = vlaneseq }
 0x637   : > { %v2000_v11 = vld [vmem:[#allocation3] sm:$0xff]  }
 0x638   : > { %1911 = vmatmul.mubr.msk.bf16.vlgmr.msra.gmra.mxu0 %vm430_vm0, %v2000_v11  ;;  %v1327_v11 = vshrl.u32 %v1326_v10, 7 }
 0x639   : > { %1833 = vmatpush3.bf16.msra.mxu0 %v2014_v58 }
 0x63a   : > { %1834 = vmatprep.subr.bf16.mxu0 %v2015_v59 }
 0x63d   : > { %1835 = vmatpush3.bf16.msra.mxu0 %v2016_v60 }
 0x63e   : > { %1836 = vmatprep.subr.bf16.mxu0 %v2017_v61 }
 0x641   : > { %1837 = vmatpush3.bf16.msra.mxu0 %v2018_v62 }
 0x642   : > { %1838 = vmatprep.subr.bf16.mxu0 %v2019_v2 }
 0x645   : > { %1839 = vmatpush3.bf16.msra.mxu0 %v2020_v3 }
 0x646   : > { %1840 = vmatprep.subr.bf16.mxu0 %v2021_v4 }
 0x649   : > { %1841 = vmatpush3.bf16.msra.mxu0 %v2022_v63 }
 0x64a   : > { %1842 = vmatprep.subr.bf16.mxu0 %v2023_v5 }
 0x64d   : > { %1843 = vmatpush3.bf16.msra.mxu0 %v2024_v6 }
 0x64e   : > { %1844 = vmatprep.subr.bf16.mxu0 %v2025_v7 }
 0x651   : > { %1845 = vmatpush3.bf16.msra.mxu0 %v2026_v46 }
 0x652   : > { %1846 = vmatprep.subr.bf16.mxu0 %v2027_v8 }
 0x655   : > { %1847 = vmatpush3.bf16.msra.mxu0 %v2028_v9 }
 0x6f8   : > { %v1262_v13 = vpop.f32.mrf.mxu0 }
 0x6f9   : > { %v1263_v14 = vadd.f32 %v1759_v12, %v1262_v13  ;;  %v1324_v13 = vld [vmem:[%s2631_s9] sm:$0x3] }
 0x6fa   : > { %v1912_v15 = vpop.f32.mrf.mxu0 }
 0x6fb   : > { %v2471_v16 = vadd.f32 %v1263_v14, %v2319_v0  ;;  %v1332_v14 = vsub.s32 1, %v1327_v11 }
 0x6fc   : > { %v1265_v17 = vpop.f32.mrf.mxu0 }
 0x6fd   : > { %v1266_v19 = vadd.f32 %v1759_v12, %v1265_v17  ;;  %v1273_v20 = vsel %vm430_vm0, %v2471_v16, 0.0  ;;  %v1328_v12 = vsub.s32 0, %v1327_v11  ;;  %v1333_v17 = vrot.slane %v1324_v13, %v1332_v14 }
 0x6fe   : > { %1274 = vadd.xlane.f32.xlu0 %v1273_v20  ;;  %v1913_v21 = vpop.f32.mrf.mxu0 }
 0x6ff   : > { %v2476_v22 = vadd.f32 %v1266_v19, %v2321_v1  ;;  %v1329_v15 = vrot.slane %v1324_v13, %v1328_v12 }
 0x701   : > { %v1276_v23 = vsel %vm430_vm0, %v2476_v22, 0.0 }
 0x702   : > { %1277 = vadd.xlane.f32.xlu1 %v1276_v23 }
 0x787   : > { %v1275_v24 = vpop.xlane.xlu0 %1274 }
 0x788   : > { %v1279_v25 = vmul.f32 0.015625, %v1275_v24 }
 0x78a   : > { %v1281_v26 = vsub.f32 %v2471_v16, %v1279_v25 }
 0x78b   : > { %v1278_v0 = vpop.xlane.xlu1 %1277 }
 0x78c   : > { %v1280_v27 = vmul.f32 0.015625, %v1278_v0  ;;  %v1283_v28 = vmul.f32 %v1281_v26, %v1281_v26 }
 0x78e   : > { %v1282_v29 = vsub.f32 %v2476_v22, %v1280_v27  ;;  %v1285_v30 = vsel %vm430_vm0, %v1283_v28, 0.0 }
 0x78f   : > { %1286 = vadd.xlane.f32.xlu0 %v1285_v30 }
 0x790   : > { %v1284_v31 = vmul.f32 %v1282_v29, %v1282_v29 }
 0x792   : > { %v1288_v1 = vsel %vm430_vm0, %v1284_v31, 0.0 }
 0x793   : > { %1289 = vadd.xlane.f32.xlu0 %v1288_v1 }
 0x818   : > { %v1287_v40 = vpop.xlane.xlu0 %1286 }
 0x819   : > { %v1291_v41 = vmul.f32 0.015625, %v1287_v40 }
 0x81b   : > { %v1293_v42 = vadd.f32 1e-05, %v1291_v41 }
 0x81c   : > { %v1290_v43 = vpop.xlane.xlu0 %1289 }
 0x81d   : > { %2065 = vrsqrt.f32 %v1293_v42  ;;  %v1292_v44 = vmul.f32 0.015625, %v1290_v43 }
 0x81f   : > { %v1294_v45 = vadd.f32 1e-05, %v1292_v44 }
 0x821   : > { %2067 = vrsqrt.f32 %v1294_v45 }
 0x82a   : > { %v2066_v47 = vpop.eup %2065 }
 0x82b   : > { %v1297_v48 = vmul.f32 %v2066_v47, %v1281_v26 }
 0x82d   : > { %v1305_v18 = vmul.f32 %v1766_v49, %v1297_v48 }
 0x82e   : > { %v2068_v50 = vpop.eup %2067 }
 0x82f   : > { %v1298_v51 = vmul.f32 %v2068_v50, %v1282_v29  ;;  %v1313_v54 = vadd.f32 %v1767_v52, %v1305_v18  ;;  %v1777_v50 = vld [vmem:[%s2633_s11] ss:$0 sm:$0xff] }
 0x831   : > { %v1306_v53 = vmul.f32 %v1766_v49, %v1298_v51 }
 0x833   : > { %v1314_v55 = vadd.f32 %v1767_v52, %v1306_v53 }
 0x835   : > { %v1315_v56 = vpack.c.bf16 %v1314_v55, %v1313_v54 }
 0x837   : > { %1776 = vmatmul.mubr.msk.bf16.vlgmr.msra.gmra.mxu1 %vm430_vm0, %v1315_v56 }
 0x8f7   : > { %v1413_v19 = vpop.f32.mrf.mxu1 }
 0x8f8   : > { %v1414_v20 = vadd.f32 %v1413_v19, %v1329_v15 }
 0x8f9   : > { %v1415_v21 = vpop.f32.mrf.mxu1 }
 0x8fa   : > { %v1416_v23 = vadd.f32 %v1415_v21, %v1333_v17  ;;  %v1427_v24 = vmul.f32 0.70710677, %v1414_v20  ;;  %v1422_v41 = vmul.f32 0.5, %v1414_v20 }
 0x8fb   : > { %v1417_v25 = vpop.f32.mrf.mxu1 }
 0x8fc   : > { %v1428_v26 = vmul.f32 0.70710677, %v1416_v23  ;;  %v1418_v0 = vadd.f32 %v1417_v25, %v1329_v15  ;;  %v1423_v38 = vmul.f32 0.5, %v1416_v23 }
 0x8fd   : > { %v1419_v27 = vpop.f32.mrf.mxu1 }
 0x8fe   : > { %2069 = verf.f32 %v1428_v26  ;;  %v1429_v28 = vmul.f32 0.70710677, %v1418_v0  ;;  %v1420_v29 = vadd.f32 %v1419_v27, %v1333_v17  ;;  %v1424_v37 = vmul.f32 0.5, %v1418_v0 }
 0x8ff   : > { %2071 = verf.f32 %v1427_v24 }
 0x900   : > { %2073 = verf.f32 %v1429_v28  ;;  %v1430_v30 = vmul.f32 0.70710677, %v1420_v29  ;;  %v1425_v39 = vmul.f32 0.5, %v1420_v29 }
 0x902   : > { %2075 = verf.f32 %v1430_v30 }
 0x90b   : > { %v2070_v31 = vpop.eup %2069 }
 0x90c   : > { %v2072_v1 = vpop.eup %2071  ;;  %v1436_v33 = vadd.f32 1.0, %v2070_v31 }
 0x90d   : > { %v2074_v32 = vpop.eup %2073  ;;  %v1435_v36 = vadd.f32 1.0, %v2072_v1 }
 0x90e   : > { %v1437_v34 = vadd.f32 1.0, %v2074_v32  ;;  %v1440_v43 = vmul.f32 %v1436_v33, %v1423_v38 }
 0x90f   : > { %v2076_v35 = vpop.eup %2075  ;;  %v1439_v45 = vmul.f32 %v1435_v36, %v1422_v41 }
 0x910   : > { %v1438_v40 = vadd.f32 1.0, %v2076_v35  ;;  %v1441_v42 = vmul.f32 %v1437_v34, %v1424_v37 }
 0x912   : > { %v1442_v44 = vmul.f32 %v1438_v40, %v1425_v39  ;;  %v1443_v48 = vpack.c.bf16 %v1441_v42, %v1439_v45 }
 0x914   : > { %v1444_v47 = vpack.c.bf16 %v1442_v44, %v1440_v43 }
 0x916   : > { %1612 = vmatprep.mubr.bf16.mxu0 %v1444_v47 }
 0x917   : > { %1613 = vmatmul.mubr.bf16.vlgmr.msra.gmra.mxu0 %v1443_v48 }
 0x9d7   : > { %v1848_v49 = vpop.f32.mrf.mxu0 }
 0x9d9   : > { %v1849_v51 = vpop.f32.mrf.mxu0 }
 0x9da   : > { %v1850_v18 = vadd.f32 %v1849_v51, %v1848_v49 }
 0x9db   : > { %v1851_v52 = vpop.f32.mrf.mxu0 }
 0x9dc   : > { %v1615_v53 = vadd.f32 %v1850_v18, %v1777_v50 }
 0x9dd   : > { %v1852_v54 = vpop.f32.mrf.mxu0 }
 0x9de   : > { %v1621_v55 = vadd.f32 %v1615_v53, %v2471_v16  ;;  %v1853_v56 = vadd.f32 %v1852_v54, %v1851_v52 }
 0x9e0   : > { %1623 = vst.msk [vmem:[%s419_s15] sm:$0xff] %vm430_vm0, %v1621_v55  ;;  %v1618_v57 = vadd.f32 %v1853_v56, %v1777_v50 }
 0x9e2   : > { %v1622_v58 = vadd.f32 %v1618_v57, %v2476_v22 }
 0x9e4   : > { %1624 = vst.msk [vmem:[%s419_s15 + $0x8] sm:$0xff] %vm430_vm0, %v1622_v58 }
 0x9e5   : > { %2116 = shalt.err (!%p2113_p2)
}
 0x9e6   : > { %s2117_s29 = scalar_lea.hbm %s2576_s26, 256  ;;  %s2121_s20 = scalar_lea.hbm %s2634_s12, 512 }
 0x9e7   : > { %p2118_p3 = scmp.ne.s32.totalorder %s2576_s26, %s2117_s29  ;;  %p2122_p8 = scmp.lt.s32.totalorder %s2576_s26, %s2634_s12 }
 0x9e8   : > { %p2123_p11 = scmp.lt.s32.totalorder %s2121_s20, %s2117_s29 }
 0x9e9   : > { %p2119_p4 = pnand %p2118_p3, %p2286_p5 }
 0x9ea   : > { %p2124_p9 = por %p2123_p11, %p2122_p8 }
 0x9eb   : > { %p2120_p7 = pneg %p2119_p4 }
 0x9ed   : > { %p2125_p10 = pnand %p2124_p9, %p2120_p7 }
 0x9ef   : > { %2128 = shalt.err (!%p2125_p10)
}
 0x9f0   : > { %s2181_s18 = smov 128   ;;  %s2182_s19 = smov 8  }
 0x9f1   : > { %1918 = dma.vmem_to_hbm [thread:$0]  (%p2286_p5), %s2578_s16, 256, %s2576_s26, %s2582_s25, %s2181_s18, %s2181_s18, %s2182_s19  }
 0x9f2 PF: > { %p1930_p12 = scmp.ge.s32.totalorder %s2167_s24, 2  ;;  %s1654_s28 = sand.u32 1, %s2155_s21  }
 0x9f3   : > { %s1655_s1 = scalar_lea.sflag [#allocation6], %s1654_s28 }
 0x9f4   : > { %p1925_p13 = pnand %p1930_p12, %p2290_p6 }
 0x9f6   : > { %p1926_p0 = pneg %p1925_p13 }
 0x9f8   : > { %2150 = dma.done.wait (%p1926_p0), %s1655_s1, 256  }
 0x9f9   : > { %2152 = vsyncadd (%p1926_p0), %s1655_s1, 4294967040  ;;  %p23_p1 = scmp.ge.s32.totalorder %s2273_s27, 4   ;;  %s2642_s21 = smov %s2159_s22 }
 0x9fa   : > { %s2643_s22 = smov %s2163_s23  ;;  %s2644_s23 = smov %s2284_s30 }
 0x9fb   : > { %s2645_s24 = smov %s2273_s27  ;;  %25 = sbr.rel (!%p23_p1) target bundleno = 7 (0x7), region = 108 }
 0xa00   :  { %1660 = vsyncpa [#allocation5], 1 }
 0xa01   :  { %1662 = vsyncpa [#allocation5 + $0x1], 1 }
 0xa02   :  { %1663 = vsyncpa [#allocation6], 1 }
 0xa03   :  { %1665 = vsyncpa [#allocation6 + $0x1], 1 }

</bundles_post_ra>
